<compile_context>
chip_gen: v7x
topology: tpu7x:2x2x1
jax: 0.10.0
libtpu: 0.0.40
codegen_flags: <defaults>
</compile_context>

<pallas_src>
import functools

import jax
import jax.numpy as jnp
from jax import lax
from jax.experimental import pallas as pl
from jax.experimental.pallas import tpu as pltpu

K_HOPS = 2      # DGL TAGConv default k=2
LANE = 128      # feature dims padded to lane width
TILE_N = 128    # node row-panel height


def _round_up(x, m):
    return (x + m - 1) // m * m


def _tagconv_layer_kernel(a_ref, h_ref, w_ref, b_ref, o_ref, h1_ref, *,
                          tile_n, fi_pad, n_real, apply_relu):
    """One TAGConv layer (k=2).  grid = (pass, panel); pass is the slow axis.

    a_ref : (tile_n, Np)        bf16  A_hat row panel (streamed, double-buffered)
    h_ref : (Np, fi_pad)        bf16  input features, resident
    w_ref : (3*fi_pad, fo_pad)  bf16  hop-stacked weight, resident
    b_ref : (1, fo_pad)         f32   bias, resident
    o_ref : (tile_n, fo_pad)          output row panel
    h1_ref: (Np, fi_pad)        bf16  scratch: full 1-hop features A_hat @ H
    """
    s = pl.program_id(0)
    p = pl.program_id(1)
    row0 = pl.multiple_of(p * tile_n, tile_n)

    @pl.when(s == 0)
    def _hop1_sweep():
        # Defined value for the pass-0 writeback of this output block.
        o_ref[...] = jnp.zeros_like(o_ref)
        h1 = jnp.dot(a_ref[...], h_ref[...], preferred_element_type=jnp.float32)
        h1_ref[pl.ds(row0, tile_n), :] = h1.astype(h1_ref.dtype)

    @pl.when(s == 1)
    def _hop2_project():
        h0 = h_ref[pl.ds(row0, tile_n), :]                       # (tile_n, fi_pad) bf16
        h1 = h1_ref[pl.ds(row0, tile_n), :]                      # (tile_n, fi_pad) bf16
        h2 = jnp.dot(a_ref[...], h1_ref[...],
                     preferred_element_type=jnp.float32).astype(jnp.bfloat16)
        # Per-hop projection with static 128-aligned W slices (no Z concat copy).
        acc = jnp.dot(h0, w_ref[0 * fi_pad:1 * fi_pad, :],
                      preferred_element_type=jnp.float32)
        acc += jnp.dot(h1, w_ref[1 * fi_pad:2 * fi_pad, :],
                       preferred_element_type=jnp.float32)
        acc += jnp.dot(h2, w_ref[2 * fi_pad:3 * fi_pad, :],
                       preferred_element_type=jnp.float32)
        acc += b_ref[...]
        if apply_relu:
            acc = jnp.maximum(acc, 0.0)
        # Zero phantom padded node rows so bias/ReLU values cannot leak later.
        row_ids = row0 + lax.broadcasted_iota(jnp.int32, acc.shape, 0)
        acc = jnp.where(row_ids < n_real, acc, 0.0)
        o_ref[...] = acc.astype(o_ref.dtype)


def _tagconv_layer(a_p, h_p, w_p, b_p, *, n_real, apply_relu, out_dtype):
    n_pad = a_p.shape[0]
    fi_pad = h_p.shape[1]
    fo_pad = w_p.shape[1]
    tile_n = min(TILE_N, n_pad)
    assert n_pad % tile_n == 0
    num_panels = n_pad // tile_n

    kern = functools.partial(_tagconv_layer_kernel, tile_n=tile_n,
                             fi_pad=fi_pad, n_real=n_real,
                             apply_relu=apply_relu)

    # VMEM budget: A panels (x2 buffers) + resident H/W/b + out panels (x2)
    # + H1 scratch, with 2x headroom; never below the ~32 MiB default scoped
    # limit, never above v7x's 64 MiB physical VMEM.
    vmem_bytes = (2 * tile_n * n_pad * 2          # A panels (bf16, double buffered)
                  + 2 * n_pad * fi_pad * 2        # H resident
                  + 2 * 3 * fi_pad * fo_pad * 2   # W resident
                  + 2 * fo_pad * 4                # bias
                  + 2 * tile_n * fo_pad * 4       # out panels
                  + n_pad * fi_pad * 2)           # H1 scratch
    vmem_limit = int(min(max(2 * vmem_bytes, 32 << 20), 64 << 20))

    return pl.pallas_call(
        kern,
        out_shape=jax.ShapeDtypeStruct((n_pad, fo_pad), out_dtype),
        grid=(2, num_panels),
        in_specs=[
            pl.BlockSpec((tile_n, n_pad), lambda s, p: (p, 0)),        # A_hat panel
            pl.BlockSpec((n_pad, fi_pad), lambda s, p: (0, 0)),        # H (resident)
            pl.BlockSpec((3 * fi_pad, fo_pad), lambda s, p: (0, 0)),   # W (resident)
            pl.BlockSpec((1, fo_pad), lambda s, p: (0, 0)),            # b (resident)
        ],
        out_specs=pl.BlockSpec((tile_n, fo_pad), lambda s, p: (p, 0)),
        scratch_shapes=[pltpu.VMEM((n_pad, fi_pad), jnp.bfloat16)],
        compiler_params=pltpu.CompilerParams(
            dimension_semantics=("arbitrary", "arbitrary"),
            vmem_limit_bytes=vmem_limit),
    )(a_p, h_p, w_p, b_p)


def tagcn_forward(a_hat, features, weights, biases, relu_flags):
    """Padded, bf16 TAGCN forward.  weights[i]: ((K+1)*fi, fo); biases[i]: (fo,)."""
    n, fin = features.shape
    n_pad = _round_up(n, TILE_N)
    fin_pad = _round_up(fin, LANE)
    n_classes = weights[-1].shape[1]

    # Zero-padded bf16 matmul operands.  Padded rows/cols of A_hat and padded
    # feature columns are zero, so real-slice results are exact up to bf16.
    a_p = jnp.zeros((n_pad, n_pad), jnp.bfloat16)
    a_p = a_p.at[:n, :n].set(a_hat.astype(jnp.bfloat16))
    h_p = jnp.zeros((n_pad, fin_pad), jnp.bfloat16)
    h_p = h_p.at[:n, :fin].set(features.astype(jnp.bfloat16))

    num_layers = len(weights)
    for li in range(num_layers):
        w, b = weights[li], biases[li]
        fi = w.shape[0] // (K_HOPS + 1)
        fo = w.shape[1]
        fi_pad = _round_up(fi, LANE)
        fo_pad = _round_up(fo, LANE)
        w_p = jnp.zeros(((K_HOPS + 1) * fi_pad, fo_pad), jnp.bfloat16)
        for k in range(K_HOPS + 1):
            w_p = w_p.at[k * fi_pad:k * fi_pad + fi, :fo].set(
                w[k * fi:(k + 1) * fi, :].astype(jnp.bfloat16))
        b_p = jnp.zeros((1, fo_pad), jnp.float32).at[0, :fo].set(b)

        last = li == num_layers - 1
        h_p = _tagconv_layer(a_p, h_p, w_p, b_p, n_real=n,
                             apply_relu=bool(relu_flags[li]),
                             out_dtype=jnp.float32 if last else jnp.bfloat16)

    return h_p[:n, :n_classes]


# relu_flags is static (tuple of bools); padding + casts fuse under jit.
tagcn_forward_jit = jax.jit(tagcn_forward, static_argnums=(4,))


def tagcn_reference_f32(a_hat, features, weights, biases, relu_flags):
    """Pure-JAX f32 reference (loose sanity check)."""
    h = features
    for w, b, relu in zip(weights, biases, relu_flags):
        fi = w.shape[0] // (K_HOPS + 1)
        h1 = a_hat @ h
        h2 = a_hat @ h1
        h = h @ w[:fi] + h1 @ w[fi:2 * fi] + h2 @ w[2 * fi:] + b
        if relu:
            h = jnp.maximum(h, 0.0)
    return h


def tagcn_reference_bf16(a_hat, features, weights, biases, relu_flags):
    """Precision-matched reference: bf16 operands, f32 accumulation, f32 bias."""
    a = a_hat.astype(jnp.bfloat16)
    h = features.astype(jnp.bfloat16)
    out = None
    num_layers = len(weights)
    for li, (w, b, relu) in enumerate(zip(weights, biases, relu_flags)):
        fi = w.shape[0] // (K_HOPS + 1)
        wb = w.astype(jnp.bfloat16)
        h1 = jnp.dot(a, h, preferred_element_type=jnp.float32).astype(jnp.bfloat16)
        h2 = jnp.dot(a, h1, preferred_element_type=jnp.float32).astype(jnp.bfloat16)
        acc = (jnp.dot(h, wb[:fi], preferred_element_type=jnp.float32)
               + jnp.dot(h1, wb[fi:2 * fi], preferred_element_type=jnp.float32)
               + jnp.dot(h2, wb[2 * fi:], preferred_element_type=jnp.float32)
               + b[None, :])
        if relu:
            acc = jnp.maximum(acc, 0.0)
        out = acc
        if li != num_layers - 1:
            h = acc.astype(jnp.bfloat16)
    return out


def build_params(key, in_feats, n_hidden, n_classes, n_layers):
    """Deterministic synthetic weights.  Linear maps stored hop-major as (3*in, out)."""
    dims = [(in_feats, n_hidden, True)]
    for _ in range(n_layers - 1):
        dims.append((n_hidden, n_hidden, True))
    dims.append((n_hidden, n_classes, False))   # classifier: no activation
    weights, biases, relus = [], [], []
    for i, (fi, fo, relu) in enumerate(dims):
        kw, kb = jax.random.split(jax.random.fold_in(key, i))
        weights.append(jax.random.normal(kw, ((K_HOPS + 1) * fi, fo), jnp.float32) * 0.1)
        biases.append(jax.random.normal(kb, (fo,), jnp.float32) * 0.01)
        relus.append(bool(relu))
    return tuple(weights), tuple(biases), tuple(relus)


if __name__ == "__main__":
    key = jax.random.PRNGKey(0)
    k_adj, k_feat, k_par = jax.random.split(key, 3)

    # Small citation-graph-like setup: 512 nodes -> 4 row panels of 128.
    N = 512
    in_feats = 32
    n_hidden = 48
    n_classes = 7
    n_layers = 2     # -> 3 TAGConv layers total (in->hid, hid->hid, hid->classes)

    # Deterministic random undirected graph (no self loops; the k=0 hop is identity).
    adj = (jax.random.uniform(k_adj, (N, N)) < 0.02).astype(jnp.float32)
    adj = jnp.maximum(adj, adj.T)
    adj = adj * (1.0 - jnp.eye(N, dtype=jnp.float32))
    deg = jnp.clip(adj.sum(axis=1), 1.0, None)
    d_inv_sqrt = 1.0 / jnp.sqrt(deg)
    a_hat = adj * d_inv_sqrt[:, None] * d_inv_sqrt[None, :]

    features = jax.random.normal(k_feat, (N, in_feats), jnp.float32)
    weights, biases, relu_flags = build_params(k_par, in_feats, n_hidden,
                                               n_classes, n_layers)

    out = tagcn_forward_jit(a_hat, features, weights, biases, relu_flags)
    out = jax.block_until_ready(out)
    assert out.shape == (N, n_classes)
    assert bool(jnp.all(jnp.isfinite(out)))

    # Tight check against a precision-matched (bf16 operand / f32 accum) reference.
    ref_bf16 = tagcn_reference_bf16(a_hat, features, weights, biases, relu_flags)
    err_bf16 = float(jnp.max(jnp.abs(out - ref_bf16)))
    assert bool(jnp.allclose(out, ref_bf16, rtol=2e-2, atol=2e-2)), (
        "precision-matched max abs err = %f" % err_bf16)

    # Loose sanity check against the pure f32 reference.
    ref_f32 = tagcn_reference_f32(a_hat, features, weights, biases, relu_flags)
    err_f32 = float(jnp.max(jnp.abs(out - ref_f32)))
    assert bool(jnp.allclose(out, ref_f32, rtol=1e-1, atol=1e-1)), (
        "f32 reference max abs err = %f" % err_f32)

    print("KERNEL_OK")
</pallas_src>

<mosaic_0001>
module attributes {stable_mosaic.version = 11 : i64} {
  func.func @_tagconv_layer_kernel(%arg0: i32, %arg1: i32, %arg2: memref<128x512xbf16, #tpu.memory_space<vmem>>, %arg3: memref<512x128xbf16, #tpu.memory_space<vmem>>, %arg4: memref<384x128xbf16, #tpu.memory_space<vmem>>, %arg5: memref<1x128xf32, #tpu.memory_space<vmem>>, %arg6: memref<128x128xbf16, #tpu.memory_space<vmem>>, %arg7: memref<512x128xbf16, #tpu.memory_space<vmem>>) attributes {dimension_semantics = [#tpu.dimension_semantics<arbitrary>, #tpu.dimension_semantics<arbitrary>], iteration_bounds = array<i64: 2, 4>, scalar_prefetch = 0 : i64, scratch_operands = 1 : i64, tpu.core_type = #tpu.core_type<tc>, window_params = [{transform_indices = @transform_0, window_bounds = array<i64: 128, 512>}, {pipeline_mode = #tpu.pipeline_mode<synchronous>, transform_indices = @transform_1, window_bounds = array<i64: 512, 128>}, {pipeline_mode = #tpu.pipeline_mode<synchronous>, transform_indices = @transform_2, window_bounds = array<i64: 384, 128>}, {pipeline_mode = #tpu.pipeline_mode<synchronous>, transform_indices = @transform_3, window_bounds = array<i64: 1, 128>}, {transform_indices = @transform_4, window_bounds = array<i64: 128, 128>}]} {
    %c128_i32 = arith.constant 128 : i32
    %0 = arith.muli %arg1, %c128_i32 : i32
    %1 = tpu.assume_multiple %0, 128 : i32
    %c0_i32 = arith.constant 0 : i32
    %2 = arith.cmpi eq, %arg0, %c0_i32 : i32
    %3 = arith.extui %2 : i1 to i32
    %c0_i32_0 = arith.constant 0 : i32
    %4 = arith.cmpi ne, %3, %c0_i32_0 : i32
    scf.if %4 {
      %cst = arith.constant 0.000000e+00 : bf16
      %8 = vector.broadcast %cst : bf16 to vector<128x128xbf16>
      %c0 = arith.constant 0 : index
      %c0_2 = arith.constant 0 : index
      %9 = vector.load %arg6[%c0, %c0_2] : memref<128x128xbf16, #tpu.memory_space<vmem>>, vector<128x128xbf16>
      tpu.vector_store %arg6[%c0, %c0_2], %8 {strides = array<i32>} : memref<128x128xbf16, #tpu.memory_space<vmem>>, vector<128x128xbf16>,
      %c0_3 = arith.constant 0 : index
      %c0_4 = arith.constant 0 : index
      %10 = vector.load %arg2[%c0_3, %c0_4] : memref<128x512xbf16, #tpu.memory_space<vmem>>, vector<128x512xbf16>
      %c0_5 = arith.constant 0 : index
      %c0_6 = arith.constant 0 : index
      %11 = vector.load %arg3[%c0_5, %c0_6] : memref<512x128xbf16, #tpu.memory_space<vmem>>, vector<512x128xbf16>
      %cst_7 = arith.constant dense<0.000000e+00> : vector<128x128xf32>
      %12 = tpu.matmul %10, %11, %cst_7 {dimension_numbers = #tpu.dot_dimension_numbers<[1], [0], [0], [1], [0, 0, 1, 1], [], []>} : vector<128x512xbf16>, vector<512x128xbf16>, vector<128x128xf32> -> vector<128x128xf32>
      %13 = arith.truncf %12 : vector<128x128xf32> to vector<128x128xbf16>
      %14 = arith.index_cast %1 : i32 to index
      %c0_8 = arith.constant 0 : index
      %15 = vector.load %arg7[%14, %c0_8] : memref<512x128xbf16, #tpu.memory_space<vmem>>, vector<128x128xbf16>
      tpu.vector_store %arg7[%14, %c0_8], %13 {strides = array<i32>} : memref<512x128xbf16, #tpu.memory_space<vmem>>, vector<128x128xbf16>,
    } else {
    }
    %c1_i32 = arith.constant 1 : i32
    %5 = arith.cmpi eq, %arg0, %c1_i32 : i32
    %6 = arith.extui %5 : i1 to i32
    %c0_i32_1 = arith.constant 0 : i32
    %7 = arith.cmpi ne, %6, %c0_i32_1 : i32
    scf.if %7 {
      %8 = arith.index_cast %1 : i32 to index
      %c0 = arith.constant 0 : index
      %9 = vector.load %arg3[%8, %c0] : memref<512x128xbf16, #tpu.memory_space<vmem>>, vector<128x128xbf16>
      %10 = arith.index_cast %1 : i32 to index
      %c0_2 = arith.constant 0 : index
      %11 = vector.load %arg7[%10, %c0_2] : memref<512x128xbf16, #tpu.memory_space<vmem>>, vector<128x128xbf16>
      %c0_3 = arith.constant 0 : index
      %c0_4 = arith.constant 0 : index
      %12 = vector.load %arg2[%c0_3, %c0_4] : memref<128x512xbf16, #tpu.memory_space<vmem>>, vector<128x512xbf16>
      %c0_5 = arith.constant 0 : index
      %c0_6 = arith.constant 0 : index
      %13 = vector.load %arg7[%c0_5, %c0_6] : memref<512x128xbf16, #tpu.memory_space<vmem>>, vector<512x128xbf16>
      %cst = arith.constant dense<0.000000e+00> : vector<128x128xf32>
      %14 = tpu.matmul %12, %13, %cst {dimension_numbers = #tpu.dot_dimension_numbers<[1], [0], [0], [1], [0, 0, 1, 1], [], []>} : vector<128x512xbf16>, vector<512x128xbf16>, vector<128x128xf32> -> vector<128x128xf32>
      %15 = arith.truncf %14 : vector<128x128xf32> to vector<128x128xbf16>
      %c0_7 = arith.constant 0 : index
      %c0_8 = arith.constant 0 : index
      %16 = vector.load %arg4[%c0_7, %c0_8] : memref<384x128xbf16, #tpu.memory_space<vmem>>, vector<128x128xbf16>
      %cst_9 = arith.constant dense<0.000000e+00> : vector<128x128xf32>
      %17 = tpu.matmul %9, %16, %cst_9 {dimension_numbers = #tpu.dot_dimension_numbers<[1], [0], [0], [1], [0, 0, 1, 1], [], []>} : vector<128x128xbf16>, vector<128x128xbf16>, vector<128x128xf32> -> vector<128x128xf32>
      %c128 = arith.constant 128 : index
      %c0_10 = arith.constant 0 : index
      %18 = vector.load %arg4[%c128, %c0_10] : memref<384x128xbf16, #tpu.memory_space<vmem>>, vector<128x128xbf16>
      %cst_11 = arith.constant dense<0.000000e+00> : vector<128x128xf32>
      %19 = tpu.matmul %11, %18, %cst_11 {dimension_numbers = #tpu.dot_dimension_numbers<[1], [0], [0], [1], [0, 0, 1, 1], [], []>} : vector<128x128xbf16>, vector<128x128xbf16>, vector<128x128xf32> -> vector<128x128xf32>
      %20 = arith.addf %17, %19 : vector<128x128xf32>
      %c256 = arith.constant 256 : index
      %c0_12 = arith.constant 0 : index
      %21 = vector.load %arg4[%c256, %c0_12] : memref<384x128xbf16, #tpu.memory_space<vmem>>, vector<128x128xbf16>
      %cst_13 = arith.constant dense<0.000000e+00> : vector<128x128xf32>
      %22 = tpu.matmul %15, %21, %cst_13 {dimension_numbers = #tpu.dot_dimension_numbers<[1], [0], [0], [1], [0, 0, 1, 1], [], []>} : vector<128x128xbf16>, vector<128x128xbf16>, vector<128x128xf32> -> vector<128x128xf32>
      %23 = arith.addf %20, %22 : vector<128x128xf32>
      %c0_14 = arith.constant 0 : index
      %c0_15 = arith.constant 0 : index
      %24 = vector.load %arg5[%c0_14, %c0_15] : memref<1x128xf32, #tpu.memory_space<vmem>>, vector<1x128xf32>
      %25 = vector.broadcast %24 : vector<1x128xf32> to vector<128x128xf32>
      %26 = arith.addf %23, %25 : vector<128x128xf32>
      %cst_16 = arith.constant 0.000000e+00 : f32
      %27 = vector.broadcast %cst_16 : f32 to vector<128x128xf32>
      %28 = arith.maximumf %26, %27 : vector<128x128xf32>
      %29 = tpu.iota {dimensions = array<i32: 0>} : vector<128x128xi32>
      %30 = vector.broadcast %1 : i32 to vector<128x128xi32>
      %31 = arith.addi %30, %29 : vector<128x128xi32>
      %c512_i32 = arith.constant 512 : i32
      %32 = vector.broadcast %c512_i32 : i32 to vector<128x128xi32>
      %33 = arith.cmpi slt, %31, %32 : vector<128x128xi32>
      %cst_17 = arith.constant 0.000000e+00 : f32
      %34 = vector.broadcast %cst_17 : f32 to vector<128x128xf32>
      %35 = arith.select %33, %28, %34 : vector<128x128xi1>, vector<128x128xf32>
      %36 = arith.truncf %35 : vector<128x128xf32> to vector<128x128xbf16>
      %c0_18 = arith.constant 0 : index
      %c0_19 = arith.constant 0 : index
      %37 = vector.load %arg6[%c0_18, %c0_19] : memref<128x128xbf16, #tpu.memory_space<vmem>>, vector<128x128xbf16>
      tpu.vector_store %arg6[%c0_18, %c0_19], %36 {strides = array<i32>} : memref<128x128xbf16, #tpu.memory_space<vmem>>, vector<128x128xbf16>,
    } else {
    }
    return
  }
  func.func @transform_0(%arg0: i32, %arg1: i32) -> (i32, i32) {
    %c0_i32 = arith.constant 0 : i32
    %c0_i32_0 = arith.constant 0 : i32
    return %arg1, %c0_i32 : i32, i32
  }
  func.func @transform_1(%arg0: i32, %arg1: i32) -> (i32, i32) {
    %c0_i32 = arith.constant 0 : i32
    %c0_i32_0 = arith.constant 0 : i32
    %c0_i32_1 = arith.constant 0 : i32
    return %c0_i32, %c0_i32_0 : i32, i32
  }
  func.func @transform_2(%arg0: i32, %arg1: i32) -> (i32, i32) {
    %c0_i32 = arith.constant 0 : i32
    %c0_i32_0 = arith.constant 0 : i32
    %c0_i32_1 = arith.constant 0 : i32
    return %c0_i32, %c0_i32_0 : i32, i32
  }
  func.func @transform_3(%arg0: i32, %arg1: i32) -> (i32, i32) {
    %c0_i32 = arith.constant 0 : i32
    %c0_i32_0 = arith.constant 0 : i32
    %c0_i32_1 = arith.constant 0 : i32
    return %c0_i32, %c0_i32_0 : i32, i32
  }
  func.func @transform_4(%arg0: i32, %arg1: i32) -> (i32, i32) {
    %c0_i32 = arith.constant 0 : i32
    %c0_i32_0 = arith.constant 0 : i32
    return %arg1, %c0_i32 : i32, i32
  }
}

module attributes {stable_mosaic.version = 11 : i64} {
  func.func @_tagconv_layer_kernel(%arg0: i32, %arg1: i32, %arg2: memref<128x512xbf16, #tpu.memory_space<vmem>>, %arg3: memref<512x128xbf16, #tpu.memory_space<vmem>>, %arg4: memref<384x128xbf16, #tpu.memory_space<vmem>>, %arg5: memref<1x128xf32, #tpu.memory_space<vmem>>, %arg6: memref<128x128xf32, #tpu.memory_space<vmem>>, %arg7: memref<512x128xbf16, #tpu.memory_space<vmem>>) attributes {dimension_semantics = [#tpu.dimension_semantics<arbitrary>, #tpu.dimension_semantics<arbitrary>], iteration_bounds = array<i64: 2, 4>, scalar_prefetch = 0 : i64, scratch_operands = 1 : i64, tpu.core_type = #tpu.core_type<tc>, window_params = [{transform_indices = @transform_0, window_bounds = array<i64: 128, 512>}, {pipeline_mode = #tpu.pipeline_mode<synchronous>, transform_indices = @transform_1, window_bounds = array<i64: 512, 128>}, {pipeline_mode = #tpu.pipeline_mode<synchronous>, transform_indices = @transform_2, window_bounds = array<i64: 384, 128>}, {pipeline_mode = #tpu.pipeline_mode<synchronous>, transform_indices = @transform_3, window_bounds = array<i64: 1, 128>}, {transform_indices = @transform_4, window_bounds = array<i64: 128, 128>}]} {
    %c128_i32 = arith.constant 128 : i32
    %0 = arith.muli %arg1, %c128_i32 : i32
    %1 = tpu.assume_multiple %0, 128 : i32
    %c0_i32 = arith.constant 0 : i32
    %2 = arith.cmpi eq, %arg0, %c0_i32 : i32
    %3 = arith.extui %2 : i1 to i32
    %c0_i32_0 = arith.constant 0 : i32
    %4 = arith.cmpi ne, %3, %c0_i32_0 : i32
    scf.if %4 {
      %cst = arith.constant 0.000000e+00 : f32
      %8 = vector.broadcast %cst : f32 to vector<128x128xf32>
      %c0 = arith.constant 0 : index
      %c0_2 = arith.constant 0 : index
      %9 = vector.load %arg6[%c0, %c0_2] : memref<128x128xf32, #tpu.memory_space<vmem>>, vector<128x128xf32>
      tpu.vector_store %arg6[%c0, %c0_2], %8 {strides = array<i32>} : memref<128x128xf32, #tpu.memory_space<vmem>>, vector<128x128xf32>,
      %c0_3 = arith.constant 0 : index
      %c0_4 = arith.constant 0 : index
      %10 = vector.load %arg2[%c0_3, %c0_4] : memref<128x512xbf16, #tpu.memory_space<vmem>>, vector<128x512xbf16>
      %c0_5 = arith.constant 0 : index
      %c0_6 = arith.constant 0 : index
      %11 = vector.load %arg3[%c0_5, %c0_6] : memref<512x128xbf16, #tpu.memory_space<vmem>>, vector<512x128xbf16>
      %cst_7 = arith.constant dense<0.000000e+00> : vector<128x128xf32>
      %12 = tpu.matmul %10, %11, %cst_7 {dimension_numbers = #tpu.dot_dimension_numbers<[1], [0], [0], [1], [0, 0, 1, 1], [], []>} : vector<128x512xbf16>, vector<512x128xbf16>, vector<128x128xf32> -> vector<128x128xf32>
      %13 = arith.truncf %12 : vector<128x128xf32> to vector<128x128xbf16>
      %14 = arith.index_cast %1 : i32 to index
      %c0_8 = arith.constant 0 : index
      %15 = vector.load %arg7[%14, %c0_8] : memref<512x128xbf16, #tpu.memory_space<vmem>>, vector<128x128xbf16>
      tpu.vector_store %arg7[%14, %c0_8], %13 {strides = array<i32>} : memref<512x128xbf16, #tpu.memory_space<vmem>>, vector<128x128xbf16>,
    } else {
    }
    %c1_i32 = arith.constant 1 : i32
    %5 = arith.cmpi eq, %arg0, %c1_i32 : i32
    %6 = arith.extui %5 : i1 to i32
    %c0_i32_1 = arith.constant 0 : i32
    %7 = arith.cmpi ne, %6, %c0_i32_1 : i32
    scf.if %7 {
      %8 = arith.index_cast %1 : i32 to index
      %c0 = arith.constant 0 : index
      %9 = vector.load %arg3[%8, %c0] : memref<512x128xbf16, #tpu.memory_space<vmem>>, vector<128x128xbf16>
      %10 = arith.index_cast %1 : i32 to index
      %c0_2 = arith.constant 0 : index
      %11 = vector.load %arg7[%10, %c0_2] : memref<512x128xbf16, #tpu.memory_space<vmem>>, vector<128x128xbf16>
      %c0_3 = arith.constant 0 : index
      %c0_4 = arith.constant 0 : index
      %12 = vector.load %arg2[%c0_3, %c0_4] : memref<128x512xbf16, #tpu.memory_space<vmem>>, vector<128x512xbf16>
      %c0_5 = arith.constant 0 : index
      %c0_6 = arith.constant 0 : index
      %13 = vector.load %arg7[%c0_5, %c0_6] : memref<512x128xbf16, #tpu.memory_space<vmem>>, vector<512x128xbf16>
      %cst = arith.constant dense<0.000000e+00> : vector<128x128xf32>
      %14 = tpu.matmul %12, %13, %cst {dimension_numbers = #tpu.dot_dimension_numbers<[1], [0], [0], [1], [0, 0, 1, 1], [], []>} : vector<128x512xbf16>, vector<512x128xbf16>, vector<128x128xf32> -> vector<128x128xf32>
      %15 = arith.truncf %14 : vector<128x128xf32> to vector<128x128xbf16>
      %c0_7 = arith.constant 0 : index
      %c0_8 = arith.constant 0 : index
      %16 = vector.load %arg4[%c0_7, %c0_8] : memref<384x128xbf16, #tpu.memory_space<vmem>>, vector<128x128xbf16>
      %cst_9 = arith.constant dense<0.000000e+00> : vector<128x128xf32>
      %17 = tpu.matmul %9, %16, %cst_9 {dimension_numbers = #tpu.dot_dimension_numbers<[1], [0], [0], [1], [0, 0, 1, 1], [], []>} : vector<128x128xbf16>, vector<128x128xbf16>, vector<128x128xf32> -> vector<128x128xf32>
      %c128 = arith.constant 128 : index
      %c0_10 = arith.constant 0 : index
      %18 = vector.load %arg4[%c128, %c0_10] : memref<384x128xbf16, #tpu.memory_space<vmem>>, vector<128x128xbf16>
      %cst_11 = arith.constant dense<0.000000e+00> : vector<128x128xf32>
      %19 = tpu.matmul %11, %18, %cst_11 {dimension_numbers = #tpu.dot_dimension_numbers<[1], [0], [0], [1], [0, 0, 1, 1], [], []>} : vector<128x128xbf16>, vector<128x128xbf16>, vector<128x128xf32> -> vector<128x128xf32>
      %20 = arith.addf %17, %19 : vector<128x128xf32>
      %c256 = arith.constant 256 : index
      %c0_12 = arith.constant 0 : index
      %21 = vector.load %arg4[%c256, %c0_12] : memref<384x128xbf16, #tpu.memory_space<vmem>>, vector<128x128xbf16>
      %cst_13 = arith.constant dense<0.000000e+00> : vector<128x128xf32>
      %22 = tpu.matmul %15, %21, %cst_13 {dimension_numbers = #tpu.dot_dimension_numbers<[1], [0], [0], [1], [0, 0, 1, 1], [], []>} : vector<128x128xbf16>, vector<128x128xbf16>, vector<128x128xf32> -> vector<128x128xf32>
      %23 = arith.addf %20, %22 : vector<128x128xf32>
      %c0_14 = arith.constant 0 : index
      %c0_15 = arith.constant 0 : index
      %24 = vector.load %arg5[%c0_14, %c0_15] : memref<1x128xf32, #tpu.memory_space<vmem>>, vector<1x128xf32>
      %25 = vector.broadcast %24 : vector<1x128xf32> to vector<128x128xf32>
      %26 = arith.addf %23, %25 : vector<128x128xf32>
      %27 = tpu.iota {dimensions = array<i32: 0>} : vector<128x128xi32>
      %28 = vector.broadcast %1 : i32 to vector<128x128xi32>
      %29 = arith.addi %28, %27 : vector<128x128xi32>
      %c512_i32 = arith.constant 512 : i32
      %30 = vector.broadcast %c512_i32 : i32 to vector<128x128xi32>
      %31 = arith.cmpi slt, %29, %30 : vector<128x128xi32>
      %cst_16 = arith.constant 0.000000e+00 : f32
      %32 = vector.broadcast %cst_16 : f32 to vector<128x128xf32>
      %33 = arith.select %31, %26, %32 : vector<128x128xi1>, vector<128x128xf32>
      %c0_17 = arith.constant 0 : index
      %c0_18 = arith.constant 0 : index
      %34 = vector.load %arg6[%c0_17, %c0_18] : memref<128x128xf32, #tpu.memory_space<vmem>>, vector<128x128xf32>
      tpu.vector_store %arg6[%c0_17, %c0_18], %33 {strides = array<i32>} : memref<128x128xf32, #tpu.memory_space<vmem>>, vector<128x128xf32>,
    } else {
    }
    return
  }
  func.func @transform_0(%arg0: i32, %arg1: i32) -> (i32, i32) {
    %c0_i32 = arith.constant 0 : i32
    %c0_i32_0 = arith.constant 0 : i32
    return %arg1, %c0_i32 : i32, i32
  }
  func.func @transform_1(%arg0: i32, %arg1: i32) -> (i32, i32) {
    %c0_i32 = arith.constant 0 : i32
    %c0_i32_0 = arith.constant 0 : i32
    %c0_i32_1 = arith.constant 0 : i32
    return %c0_i32, %c0_i32_0 : i32, i32
  }
  func.func @transform_2(%arg0: i32, %arg1: i32) -> (i32, i32) {
    %c0_i32 = arith.constant 0 : i32
    %c0_i32_0 = arith.constant 0 : i32
    %c0_i32_1 = arith.constant 0 : i32
    return %c0_i32, %c0_i32_0 : i32, i32
  }
  func.func @transform_3(%arg0: i32, %arg1: i32) -> (i32, i32) {
    %c0_i32 = arith.constant 0 : i32
    %c0_i32_0 = arith.constant 0 : i32
    %c0_i32_1 = arith.constant 0 : i32
    return %c0_i32, %c0_i32_0 : i32, i32
  }
  func.func @transform_4(%arg0: i32, %arg1: i32) -> (i32, i32) {
    %c0_i32 = arith.constant 0 : i32
    %c0_i32_0 = arith.constant 0 : i32
    return %arg1, %c0_i32 : i32, i32
  }
}

</mosaic_0001>

<bundles_post_ra>
// kernel: tagcn_forward.3
= control target key start
LH: loop header
LB: loop body
LE: loop exit
PB: predicated region body
PF: predicated region fallthrough
CT: control target
= control target key end

     0   :  { %s3094_s15 = smov 0   ;;  %s3096_s16 = smov 0   ;;  %s3532_s0 = inlined_call_operand.vmem [shape: bf16[512,512], index: 0, kind: input, shape index: {}]   ;;  %s3533_s1 = inlined_call_operand.vmem [shape: bf16[512,128], index: 1, kind: input, shape index: {}]   ;;  %s3534_s2 = inlined_call_operand.vmem [shape: bf16[384,128], index: 2, kind: input, shape index: {}]   ;;  %s3535_s3 = inlined_call_operand.vmem [shape: f32[1,128], index: 3, kind: input, shape index: {}]   ;;  %s3536_s4 = inlined_call_operand.vmem [shape: bf16[512,128], index: 4, kind: output, shape index: {}]  }
   0x1   :  { %s3098_s17 = smov 0   ;;  %s3100_s18 = smov 0  }
   0x2   :  { %s3102_s19 = smov 0  }
   0x3 LB: > { %s23_s20 = sadd.s32 1, %s3058_s17  ;;  %s26_s21 = sadd.s32 1, %s3062_s18  ;;  %s3066_s19 = sphi %s3102_s19, %s14_s19   ;;  %s3062_s18 = sphi %s3100_s18, %s3540_s18   ;;  %s3058_s17 = sphi %s3098_s17, %s3539_s17   ;;  %s3054_s16 = sphi %s3096_s16, %s3538_s16   ;;  %s3050_s15 = sphi %s3094_s15, %s3537_s15  }
   0x4   : > { %p24_p0 = scmp.ge.s32.totalorder %s23_s20, 4  ;;  %p2172_p1 = scmp.ge.s32.totalorder %s3066_s19, 1 }
   0x5   : > { %p176_p2 = scmp.lt.s32.totalorder %s3066_s19, 9 }
   0x6   : > { %s3542_s20 = smov (%p24_p0, %s23_s20), 0  ;;  %s3544_s21 = smov (!%p24_p0, %s26_s21), %s3062_s18 }
   0x7   : > { %p177_p3 = pnand %p2172_p1, %p176_p2  ;;  %p28_p4 = scmp.ge.s32.totalorder %s3544_s21, 2 }
   0x8   : > { %s2173_s22 = sshll.u32 (!%p177_p3), %s3050_s15, 4  ;;  %s3126_s23 = sshll.u32 (!%p177_p3), %s3050_s15, 7 }
   0x9   : > { %s3546_s21 = smov (%p28_p4, %s3544_s21), 0  ;;  %180 = sbr.rel (%p177_p3) target bundleno = 933 (0x3a5), region = 36 }
   0xa   : > { %p204_p5 = scmp.lt.s32.totalorder (!%p177_p3), %s2173_s22, 63  ;;  %p2179_p6 = scmp.ne.s32.totalorder (!%p177_p3), %s3054_s16, 0 }
  0x10   : > { %s3548_s22 = smov (!%p204_p5, %s2173_s22), 63  ;;  %221 = sbr.rel (%p2179_p6) target bundleno = 330 (0x14a), region = 40 }
  0x11   : > { %s2331_s24 = sshll.u32 %s3548_s22, 4  ;;  %s2177_s25 = sshll.u32 %s3548_s22, 2  ;;  %v2868_v0 = vld [vmem:[%s3533_s1 + $0x40] sm:$0xff] (!%p2179_p6)   ;;  %v3068_v1 = vmov (!%p2179_p6), 0   ;;  %v2872_v5 = vld [vmem:[%s3533_s1 + $0x48] sm:$0xff] (!%p2179_p6)   ;;  %v2876_v9 = vld [vmem:[%s3533_s1 + $0x50] sm:$0xff] (!%p2179_p6)  }
  0x12   : > { %s3131_s28 = scalar_lea.vmem %s3532_s0, %s2331_s24  ;;  %s3136_s5 = scalar_lea.vmem %s3536_s4, %s2177_s25  ;;  %v2869_v2 = vld [vmem:[%s3533_s1 + $0xc0] sm:$0xff] (!%p2179_p6)   ;;  %2395 = vmatprep.subr.bf16.mxu0 (!%p2179_p6), %v2868_v0  ;;  %v2873_v6 = vld [vmem:[%s3533_s1 + $0xc8] sm:$0xff] (!%p2179_p6)   ;;  %v2877_v10 = vld [vmem:[%s3533_s1 + $0xd0] sm:$0xff] (!%p2179_p6)  }
  0x13   : > { %222 = vst [vmem:[%s3136_s5] sm:$0xf] (!%p2179_p6), %v3068_v1  ;;  %223 = vst [vmem:[%s3136_s5 + $0x4] sm:$0xf] (!%p2179_p6), %v3068_v1  ;;  %v2870_v3 = vld [vmem:[%s3533_s1] sm:$0xff] (!%p2179_p6)   ;;  %2459 = vmatprep.subr.bf16.mxu1 (!%p2179_p6), %v2869_v2  ;;  %v2874_v7 = vld [vmem:[%s3533_s1 + $0x8] sm:$0xff] (!%p2179_p6)   ;;  %s888_s26 = sshra.s32 (!%p2179_p6), %s3126_s23, 4 }
  0x14   : > { %224 = vst [vmem:[%s3136_s5 + $0x8] sm:$0xf] (!%p2179_p6), %v3068_v1  ;;  %225 = vst [vmem:[%s3136_s5 + $0xc] sm:$0xf] (!%p2179_p6), %v3068_v1  ;;  %v2871_v4 = vld [vmem:[%s3533_s1 + $0x80] sm:$0xff] (!%p2179_p6)   ;;  %2396 = vmatpush3.bf16.msra.mxu0 (!%p2179_p6), %v2870_v3  ;;  %v2875_v8 = vld [vmem:[%s3533_s1 + $0x88] sm:$0xff] (!%p2179_p6)  }
  0x15   : > { %226 = vst [vmem:[%s3136_s5 + $0x10] sm:$0xf] (!%p2179_p6), %v3068_v1  ;;  %227 = vst [vmem:[%s3136_s5 + $0x14] sm:$0xf] (!%p2179_p6), %v3068_v1  ;;  %2460 = vmatpush3.bf16.msra.mxu1 (!%p2179_p6), %v2871_v4  ;;  %2397 = vmatprep.subr.bf16.mxu0 (!%p2179_p6), %v2872_v5  ;;  %v2878_v11 = vld [vmem:[%s3533_s1 + $0x10] sm:$0xff] (!%p2179_p6)   ;;  %v2880_v13 = vld [vmem:[%s3533_s1 + $0x58] sm:$0xff] (!%p2179_p6)  }
  0x16   : > { %228 = vst [vmem:[%s3136_s5 + $0x18] sm:$0xf] (!%p2179_p6), %v3068_v1  ;;  %229 = vst [vmem:[%s3136_s5 + $0x1c] sm:$0xf] (!%p2179_p6), %v3068_v1  ;;  %2461 = vmatprep.subr.bf16.mxu1 (!%p2179_p6), %v2873_v6  ;;  %v2879_v12 = vld [vmem:[%s3533_s1 + $0x90] sm:$0xff] (!%p2179_p6)   ;;  %v2881_v14 = vld [vmem:[%s3533_s1 + $0xd8] sm:$0xff] (!%p2179_p6)  }
  0x17   : > { %230 = vst [vmem:[%s3136_s5 + $0x20] sm:$0xf] %v3068_v1  ;;  %231 = vst [vmem:[%s3136_s5 + $0x24] sm:$0xf] %v3068_v1  ;;  %v2882_v15 = vld [vmem:[%s3533_s1 + $0x18] sm:$0xff]   ;;  %v2884_v17 = vld [vmem:[%s3533_s1 + $0x60] sm:$0xff]  }
  0x18   : > { %232 = vst [vmem:[%s3136_s5 + $0x28] sm:$0xf] %v3068_v1  ;;  %233 = vst [vmem:[%s3136_s5 + $0x2c] sm:$0xf] %v3068_v1  ;;  %2398 = vmatpush3.bf16.msra.mxu0 %v2874_v7  ;;  %v2883_v16 = vld [vmem:[%s3533_s1 + $0x98] sm:$0xff]   ;;  %v2885_v18 = vld [vmem:[%s3533_s1 + $0xe0] sm:$0xff]  }
  0x19   : > { %234 = vst [vmem:[%s3136_s5 + $0x30] sm:$0xf] %v3068_v1  ;;  %235 = vst [vmem:[%s3136_s5 + $0x34] sm:$0xf] %v3068_v1  ;;  %2462 = vmatpush3.bf16.msra.mxu1 %v2875_v8  ;;  %2399 = vmatprep.subr.bf16.mxu0 %v2876_v9  ;;  %v2886_v19 = vld [vmem:[%s3533_s1 + $0x20] sm:$0xff]   ;;  %v2888_v21 = vld [vmem:[%s3533_s1 + $0x68] sm:$0xff]  }
  0x1a   : > { %236 = vst [vmem:[%s3136_s5 + $0x38] sm:$0xf] %v3068_v1  ;;  %237 = vst [vmem:[%s3136_s5 + $0x3c] sm:$0xf] %v3068_v1  ;;  %2463 = vmatprep.subr.bf16.mxu1 %v2877_v10  ;;  %v2887_v20 = vld [vmem:[%s3533_s1 + $0xa0] sm:$0xff]   ;;  %v2889_v22 = vld [vmem:[%s3533_s1 + $0xe8] sm:$0xff]  }
  0x1b   : > { %v2890_v23 = vld [vmem:[%s3533_s1 + $0x28] sm:$0xff]   ;;  %v2892_v25 = vld [vmem:[%s3533_s1 + $0x70] sm:$0xff]   ;;  %v2896_v29 = vld [vmem:[%s3533_s1 + $0x78] sm:$0xff]   ;;  %s2244_s27 = sshll.u32 %s888_s26, 3 }
  0x1c   : > { %2400 = vmatpush3.bf16.msra.mxu0 %v2878_v11  ;;  %v2891_v24 = vld [vmem:[%s3533_s1 + $0xa8] sm:$0xff]   ;;  %v2893_v26 = vld [vmem:[%s3533_s1 + $0xf0] sm:$0xff]   ;;  %v2897_v30 = vld [vmem:[%s3533_s1 + $0xf8] sm:$0xff]   ;;  %s3284_s29 = scalar_lea.vmem [#allocation2], %s2244_s27 }
  0x1d   : > { %2464 = vmatpush3.bf16.msra.mxu1 %v2879_v12  ;;  %2401 = vmatprep.subr.bf16.mxu0 %v2880_v13  ;;  %v2894_v27 = vld [vmem:[%s3533_s1 + $0x30] sm:$0xff]   ;;  %v2898_v31 = vld [vmem:[%s3533_s1 + $0x38] sm:$0xff]  }
  0x1e   : > { %2465 = vmatprep.subr.bf16.mxu1 %v2881_v14  ;;  %v2895_v28 = vld [vmem:[%s3533_s1 + $0xb0] sm:$0xff]   ;;  %v2899_v32 = vld [vmem:[%s3533_s1 + $0xb8] sm:$0xff]  }
  0x1f   : > { %v2900_v33 = vld [vmem:[%s3131_s28] ss:$16 sps:$4 sm:$0xff]   ;;  %v2902_v34 = vld [vmem:[%s3131_s28 + $0x4] ss:$16 sps:$4 sm:$0xff]   ;;  %v2903_v35 = vld [vmem:[%s3131_s28 + $0x8] ss:$16 sps:$4 sm:$0xff]  }
  0x20   : > { %2402 = vmatpush3.bf16.msra.mxu0 %v2882_v15  ;;  %v2905_v36 = vld [vmem:[%s3131_s28 + $0xc] ss:$16 sps:$4 sm:$0xff]   ;;  %718 = vmatprep.mubr.bf16.mxu0 %v2902_v34  ;;  %v2906_v37 = vld [vmem:[%s3131_s28 + $0x24] ss:$16 sps:$4 sm:$0xff]   ;;  %v2910_v39 = vld [vmem:[%s3131_s28 + $0x20] ss:$16 sps:$4 sm:$0xff]  }
  0x21   : > { %2466 = vmatpush3.bf16.msra.mxu1 %v2883_v16  ;;  %2403 = vmatprep.subr.bf16.mxu0 %v2884_v17  ;;  %v2908_v38 = vld [vmem:[%s3131_s28 + $0x2c] ss:$16 sps:$4 sm:$0xff]   ;;  %v2911_v40 = vld [vmem:[%s3131_s28 + $0x28] ss:$16 sps:$4 sm:$0xff]   ;;  %v2912_v41 = vld [vmem:[%s3131_s28 + $0x44] ss:$16 sps:$4 sm:$0xff]  }
  0x22   : > { %2467 = vmatprep.subr.bf16.mxu1 %v2885_v18  ;;  %815 = vmatprep.mubr.bf16.mxu1 %v2905_v36  ;;  %v2914_v42 = vld [vmem:[%s3131_s28 + $0x4c] ss:$16 sps:$4 sm:$0xff]   ;;  %v2916_v43 = vld [vmem:[%s3131_s28 + $0x40] ss:$16 sps:$4 sm:$0xff]   ;;  %v2917_v44 = vld [vmem:[%s3131_s28 + $0x48] ss:$16 sps:$4 sm:$0xff]  }
  0x23   : > { %v2918_v45 = vld [vmem:[%s3131_s28 + $0x64] ss:$16 sps:$4 sm:$0xff]   ;;  %v2920_v46 = vld [vmem:[%s3131_s28 + $0x6c] ss:$16 sps:$4 sm:$0xff]   ;;  %v2922_v47 = vld [vmem:[%s3131_s28 + $0x60] ss:$16 sps:$4 sm:$0xff]  }
  0x24   : > { %2404 = vmatpush3.bf16.msra.mxu0 %v2886_v19  ;;  %v2923_v48 = vld [vmem:[%s3131_s28 + $0x68] ss:$16 sps:$4 sm:$0xff]   ;;  %v2924_v49 = vld [vmem:[%s3131_s28 + $0x84] ss:$16 sps:$4 sm:$0xff]   ;;  %v2926_v50 = vld [vmem:[%s3131_s28 + $0x8c] ss:$16 sps:$4 sm:$0xff]  }
  0x25   : > { %2468 = vmatpush3.bf16.msra.mxu1 %v2887_v20  ;;  %2405 = vmatprep.subr.bf16.mxu0 %v2888_v21  ;;  %v2928_v51 = vld [vmem:[%s3131_s28 + $0x80] ss:$16 sps:$4 sm:$0xff]   ;;  %v2929_v52 = vld [vmem:[%s3131_s28 + $0x88] ss:$16 sps:$4 sm:$0xff]   ;;  %v2930_v53 = vld [vmem:[%s3131_s28 + $0xa4] ss:$16 sps:$4 sm:$0xff]  }
  0x26   : > { %2469 = vmatprep.subr.bf16.mxu1 %v2889_v22  ;;  %v2932_v54 = vld [vmem:[%s3131_s28 + $0xac] ss:$16 sps:$4 sm:$0xff]   ;;  %v2934_v55 = vld [vmem:[%s3131_s28 + $0xa0] ss:$16 sps:$4 sm:$0xff]   ;;  %v2935_v56 = vld [vmem:[%s3131_s28 + $0xa8] ss:$16 sps:$4 sm:$0xff]  }
  0x27   : > { %v2936_v57 = vld [vmem:[%s3131_s28 + $0xc4] ss:$16 sps:$4 sm:$0xff]   ;;  %v2938_v58 = vld [vmem:[%s3131_s28 + $0xcc] ss:$16 sps:$4 sm:$0xff]   ;;  %v2940_v59 = vld [vmem:[%s3131_s28 + $0xc0] ss:$16 sps:$4 sm:$0xff]  }
  0x28   : > { %2406 = vmatpush3.bf16.msra.mxu0 %v2890_v23  ;;  %v2941_v60 = vld [vmem:[%s3131_s28 + $0xc8] ss:$16 sps:$4 sm:$0xff]   ;;  %v2942_v61 = vld [vmem:[%s3131_s28 + $0xe4] ss:$16 sps:$4 sm:$0xff]   ;;  %v2944_v62 = vld [vmem:[%s3131_s28 + $0xec] ss:$16 sps:$4 sm:$0xff]  }
  0x29   : > { %2470 = vmatpush3.bf16.msra.mxu1 %v2891_v24  ;;  %2407 = vmatprep.subr.bf16.mxu0 %v2892_v25  ;;  %v2946_v63 = vld [vmem:[%s3131_s28 + $0xe0] ss:$16 sps:$4 sm:$0xff]   ;;  %v2947_v0 = vld [vmem:[%s3131_s28 + $0xe8] ss:$16 sps:$4 sm:$0xff]  }
  0x2a   : > { %2471 = vmatprep.subr.bf16.mxu1 %v2893_v26 }
  0x2c   : > { %2408 = vmatpush3.bf16.msra.mxu0 %v2894_v27 }
  0x2d   : > { %2472 = vmatpush3.bf16.msra.mxu1 %v2895_v28  ;;  %2409 = vmatprep.subr.bf16.mxu0 %v2896_v29 }
  0x2e   : > { %2473 = vmatprep.subr.bf16.mxu1 %v2897_v30 }
  0x30   : > { %2410 = vmatpush3.bf16.msra.mxu0 %v2898_v31 }
  0x31   : > { %2474 = vmatpush3.bf16.msra.mxu1 %v2899_v32 }
  0x33   : > { %719 = vmatmul.mubr.bf16.vlgmr.msra.gmra.mrb[0].mxu0 %v2900_v33 }
  0x34   : > { %816 = vmatmul.mubr.bf16.vlgmr.msra.gmra.mrb[0].mxu1 %v2903_v35  ;;  %726 = vmatprep.mubr.bf16.mxu0 %v2906_v37 }
  0x35   : > { %823 = vmatprep.mubr.bf16.mxu1 %v2908_v38 }
  0x3b   : > { %727 = vmatmul.mubr.bf16.gmra.mrb[4].mxu0 %v2910_v39 }
  0x3c   : > { %824 = vmatmul.mubr.bf16.gmra.mrb[4].mxu1 %v2911_v40  ;;  %734 = vmatprep.mubr.bf16.mxu0 %v2912_v41 }
  0x3d   : > { %831 = vmatprep.mubr.bf16.mxu1 %v2914_v42 }
  0x43   : > { %735 = vmatmul.mubr.bf16.gmra.mrb[8].mxu0 %v2916_v43 }
  0x44   : > { %832 = vmatmul.mubr.bf16.gmra.mrb[8].mxu1 %v2917_v44  ;;  %742 = vmatprep.mubr.bf16.mxu0 %v2918_v45 }
  0x45   : > { %839 = vmatprep.mubr.bf16.mxu1 %v2920_v46 }
  0x4b   : > { %743 = vmatmul.mubr.bf16.gmra.mrb[12].mxu0 %v2922_v47 }
  0x4c   : > { %840 = vmatmul.mubr.bf16.gmra.mrb[12].mxu1 %v2923_v48  ;;  %750 = vmatprep.mubr.bf16.mxu0 %v2924_v49 }
  0x4d   : > { %847 = vmatprep.mubr.bf16.mxu1 %v2926_v50 }
  0x53   : > { %751 = vmatmul.mubr.bf16.gmra.mrb[16].mxu0 %v2928_v51 }
  0x54   : > { %848 = vmatmul.mubr.bf16.gmra.mrb[16].mxu1 %v2929_v52  ;;  %758 = vmatprep.mubr.bf16.mxu0 %v2930_v53 }
  0x55   : > { %855 = vmatprep.mubr.bf16.mxu1 %v2932_v54 }
  0x5b   : > { %759 = vmatmul.mubr.bf16.gmra.mrb[20].mxu0 %v2934_v55 }
  0x5c   : > { %856 = vmatmul.mubr.bf16.gmra.mrb[20].mxu1 %v2935_v56  ;;  %766 = vmatprep.mubr.bf16.mxu0 %v2936_v57 }
  0x5d   : > { %863 = vmatprep.mubr.bf16.mxu1 %v2938_v58 }
  0x63   : > { %767 = vmatmul.mubr.bf16.gmra.mrb[24].mxu0 %v2940_v59 }
  0x64   : > { %864 = vmatmul.mubr.bf16.gmra.mrb[24].mxu1 %v2941_v60  ;;  %774 = vmatprep.mubr.bf16.mxu0 %v2942_v61 }
  0x65   : > { %871 = vmatprep.mubr.bf16.mxu1 %v2944_v62 }
  0x6b   : > { %775 = vmatmul.mubr.bf16.gmra.mrb[28].mxu0 %v2946_v63 }
  0x6c   : > { %872 = vmatmul.mubr.bf16.gmra.mrb[28].mxu1 %v2947_v0 }
 0x106   : > { %v2411_v1 = vpop.f32.mrb[0].mxu0 }
 0x107   : > { %v2475_v2 = vpop.f32.mrb[0].mxu1  ;;  %v2412_v3 = vpop.f32.mrb[1].mxu0 }
 0x108   : > { %v2413_v4 = vadd.f32 %v2412_v3, %v2411_v1  ;;  %v2476_v5 = vpop.f32.mrb[1].mxu1  ;;  %v2414_v6 = vpop.f32.mrb[2].mxu0 }
 0x109   : > { %v2477_v7 = vadd.f32 %v2476_v5, %v2475_v2  ;;  %v2478_v8 = vpop.f32.mrb[2].mxu1  ;;  %v2415_v9 = vpop.f32.mrb[3].mxu0 }
 0x10a   : > { %v2416_v10 = vadd.f32 %v2415_v9, %v2414_v6  ;;  %v2479_v11 = vpop.f32.mrb[3].mxu1 }
 0x10b   : > { %v818_v12 = vadd.f32 %v2477_v7, %v2413_v4  ;;  %v2480_v13 = vadd.f32 %v2479_v11, %v2478_v8 }
 0x10d   : > { %v821_v14 = vadd.f32 %v2480_v13, %v2416_v10 }
 0x10e   : > { %v2417_v15 = vpop.f32.mrb[4].mxu0 }
 0x10f   : > { %v880_v16 = vpack.c.bf16 %v821_v14, %v818_v12  ;;  %v2481_v17 = vpop.f32.mrb[4].mxu1  ;;  %v2418_v18 = vpop.f32.mrb[5].mxu0 }
 0x110   : > { %v2419_v19 = vadd.f32 %v2418_v18, %v2417_v15  ;;  %v2482_v20 = vpop.f32.mrb[5].mxu1  ;;  %v2420_v21 = vpop.f32.mrb[6].mxu0 }
 0x111   : > { %892 = vst [vmem:[%s3284_s29] sm:$0xff] %v880_v16  ;;  %v2483_v22 = vadd.f32 %v2482_v20, %v2481_v17  ;;  %v2484_v23 = vpop.f32.mrb[6].mxu1  ;;  %v2421_v24 = vpop.f32.mrb[7].mxu0 }
 0x112   : > { %v2422_v25 = vadd.f32 %v2421_v24, %v2420_v21  ;;  %v2485_v26 = vpop.f32.mrb[7].mxu1 }
 0x113   : > { %v826_v27 = vadd.f32 %v2483_v22, %v2419_v19  ;;  %v2486_v28 = vadd.f32 %v2485_v26, %v2484_v23 }
 0x115   : > { %v829_v29 = vadd.f32 %v2486_v28, %v2422_v25 }
 0x116   : > { %v2423_v30 = vpop.f32.mrb[8].mxu0 }
 0x117   : > { %v881_v31 = vpack.c.bf16 %v829_v29, %v826_v27  ;;  %v2487_v32 = vpop.f32.mrb[8].mxu1  ;;  %v2424_v33 = vpop.f32.mrb[9].mxu0 }
 0x118   : > { %v2425_v34 = vadd.f32 %v2424_v33, %v2423_v30  ;;  %v2488_v35 = vpop.f32.mrb[9].mxu1  ;;  %v2426_v36 = vpop.f32.mrb[10].mxu0 }
 0x119   : > { %893 = vst [vmem:[%s3284_s29 + $0x8] sm:$0xff] %v881_v31  ;;  %v2489_v37 = vadd.f32 %v2488_v35, %v2487_v32  ;;  %v2490_v38 = vpop.f32.mrb[10].mxu1  ;;  %v2427_v39 = vpop.f32.mrb[11].mxu0 }
 0x11a   : > { %v2428_v40 = vadd.f32 %v2427_v39, %v2426_v36  ;;  %v2491_v41 = vpop.f32.mrb[11].mxu1 }
 0x11b   : > { %v834_v42 = vadd.f32 %v2489_v37, %v2425_v34  ;;  %v2492_v43 = vadd.f32 %v2491_v41, %v2490_v38 }
 0x11d   : > { %v837_v44 = vadd.f32 %v2492_v43, %v2428_v40 }
 0x11e   : > { %v2429_v45 = vpop.f32.mrb[12].mxu0 }
 0x11f   : > { %v882_v46 = vpack.c.bf16 %v837_v44, %v834_v42  ;;  %v2493_v47 = vpop.f32.mrb[12].mxu1  ;;  %v2430_v48 = vpop.f32.mrb[13].mxu0 }
 0x120   : > { %v2431_v49 = vadd.f32 %v2430_v48, %v2429_v45  ;;  %v2494_v50 = vpop.f32.mrb[13].mxu1  ;;  %v2432_v51 = vpop.f32.mrb[14].mxu0 }
 0x121   : > { %894 = vst [vmem:[%s3284_s29 + $0x10] sm:$0xff] %v882_v46  ;;  %v2495_v52 = vadd.f32 %v2494_v50, %v2493_v47  ;;  %v2496_v53 = vpop.f32.mrb[14].mxu1  ;;  %v2433_v54 = vpop.f32.mrb[15].mxu0 }
 0x122   : > { %v2434_v55 = vadd.f32 %v2433_v54, %v2432_v51  ;;  %v2497_v56 = vpop.f32.mrb[15].mxu1 }
 0x123   : > { %v842_v57 = vadd.f32 %v2495_v52, %v2431_v49  ;;  %v2498_v58 = vadd.f32 %v2497_v56, %v2496_v53 }
 0x125   : > { %v845_v59 = vadd.f32 %v2498_v58, %v2434_v55 }
 0x126   : > { %v2435_v60 = vpop.f32.mrb[16].mxu0 }
 0x127   : > { %v883_v61 = vpack.c.bf16 %v845_v59, %v842_v57  ;;  %v2499_v62 = vpop.f32.mrb[16].mxu1  ;;  %v2436_v63 = vpop.f32.mrb[17].mxu0 }
 0x128   : > { %v2437_v0 = vadd.f32 %v2436_v63, %v2435_v60  ;;  %v2500_v1 = vpop.f32.mrb[17].mxu1  ;;  %v2438_v2 = vpop.f32.mrb[18].mxu0 }
 0x129   : > { %895 = vst [vmem:[%s3284_s29 + $0x18] sm:$0xff] %v883_v61  ;;  %v2501_v3 = vadd.f32 %v2500_v1, %v2499_v62  ;;  %v2502_v4 = vpop.f32.mrb[18].mxu1  ;;  %v2439_v5 = vpop.f32.mrb[19].mxu0 }
 0x12a   : > { %v2440_v6 = vadd.f32 %v2439_v5, %v2438_v2  ;;  %v2503_v7 = vpop.f32.mrb[19].mxu1 }
 0x12b   : > { %v850_v8 = vadd.f32 %v2501_v3, %v2437_v0  ;;  %v2504_v9 = vadd.f32 %v2503_v7, %v2502_v4 }
 0x12d   : > { %v853_v10 = vadd.f32 %v2504_v9, %v2440_v6 }
 0x12e   : > { %v2441_v11 = vpop.f32.mrb[20].mxu0 }
 0x12f   : > { %v884_v12 = vpack.c.bf16 %v853_v10, %v850_v8  ;;  %v2505_v13 = vpop.f32.mrb[20].mxu1  ;;  %v2442_v14 = vpop.f32.mrb[21].mxu0 }
 0x130   : > { %v2443_v15 = vadd.f32 %v2442_v14, %v2441_v11  ;;  %v2506_v16 = vpop.f32.mrb[21].mxu1  ;;  %v2444_v17 = vpop.f32.mrb[22].mxu0 }
 0x131   : > { %896 = vst [vmem:[%s3284_s29 + $0x20] sm:$0xff] %v884_v12  ;;  %v2507_v18 = vadd.f32 %v2506_v16, %v2505_v13  ;;  %v2508_v19 = vpop.f32.mrb[22].mxu1  ;;  %v2445_v20 = vpop.f32.mrb[23].mxu0 }
 0x132   : > { %v2446_v21 = vadd.f32 %v2445_v20, %v2444_v17  ;;  %v2509_v22 = vpop.f32.mrb[23].mxu1 }
 0x133   : > { %v858_v23 = vadd.f32 %v2507_v18, %v2443_v15  ;;  %v2510_v24 = vadd.f32 %v2509_v22, %v2508_v19 }
 0x135   : > { %v861_v25 = vadd.f32 %v2510_v24, %v2446_v21 }
 0x136   : > { %v2447_v26 = vpop.f32.mrb[24].mxu0 }
 0x137   : > { %v885_v27 = vpack.c.bf16 %v861_v25, %v858_v23  ;;  %v2511_v28 = vpop.f32.mrb[24].mxu1  ;;  %v2448_v29 = vpop.f32.mrb[25].mxu0 }
 0x138   : > { %v2449_v30 = vadd.f32 %v2448_v29, %v2447_v26  ;;  %v2512_v31 = vpop.f32.mrb[25].mxu1  ;;  %v2450_v32 = vpop.f32.mrb[26].mxu0 }
 0x139   : > { %897 = vst [vmem:[%s3284_s29 + $0x28] sm:$0xff] %v885_v27  ;;  %v2513_v33 = vadd.f32 %v2512_v31, %v2511_v28  ;;  %v2514_v34 = vpop.f32.mrb[26].mxu1  ;;  %v2451_v35 = vpop.f32.mrb[27].mxu0 }
 0x13a   : > { %v2452_v36 = vadd.f32 %v2451_v35, %v2450_v32  ;;  %v2515_v37 = vpop.f32.mrb[27].mxu1 }
 0x13b   : > { %v866_v38 = vadd.f32 %v2513_v33, %v2449_v30  ;;  %v2516_v39 = vadd.f32 %v2515_v37, %v2514_v34 }
 0x13d   : > { %v869_v40 = vadd.f32 %v2516_v39, %v2452_v36 }
 0x13e   : > { %v2453_v41 = vpop.f32.mrb[28].mxu0 }
 0x13f   : > { %v886_v42 = vpack.c.bf16 %v869_v40, %v866_v38  ;;  %v2517_v43 = vpop.f32.mrb[28].mxu1  ;;  %v2454_v44 = vpop.f32.mrb[29].mxu0 }
 0x140   : > { %v2455_v45 = vadd.f32 %v2454_v44, %v2453_v41  ;;  %v2518_v46 = vpop.f32.mrb[29].mxu1  ;;  %v2456_v47 = vpop.f32.mrb[30].mxu0 }
 0x141   : > { %898 = vst [vmem:[%s3284_s29 + $0x30] sm:$0xff] %v886_v42  ;;  %v2519_v48 = vadd.f32 %v2518_v46, %v2517_v43  ;;  %v2520_v49 = vpop.f32.mrb[30].mxu1  ;;  %v2457_v50 = vpop.f32.mrb[31].mxu0 }
 0x142   : > { %v2458_v51 = vadd.f32 %v2457_v50, %v2456_v47  ;;  %v2521_v52 = vpop.f32.mrb[31].mxu1 }
 0x143   : > { %v874_v53 = vadd.f32 %v2519_v48, %v2455_v45  ;;  %v2522_v54 = vadd.f32 %v2521_v52, %v2520_v49 }
 0x145   : > { %v877_v55 = vadd.f32 %v2522_v54, %v2458_v51 }
 0x147   : > { %v887_v56 = vpack.c.bf16 %v877_v55, %v874_v53 }
 0x149   : > { %899 = vst [vmem:[%s3284_s29 + $0x38] sm:$0xff] %v887_v56 }
 0x14a PF: > { %p2245_p7 = scmp.ne.s32.totalorder %s3054_s16, 1 }
 0x14b   : > { %v2950_v62 = vld [vmem:[%s3131_s28 + $0x4] ss:$16 sps:$4 sm:$0xff] (!%p2245_p7)   ;;  %v2948_v11 = vld [vmem:[%s3131_s28] ss:$16 sps:$4 sm:$0xff] (!%p2245_p7)   ;;  %v2997_v17 = vld [vmem:[%s3534_s2 + $0x48] sm:$0xff] (!%p2245_p7)   ;;  %s924_s27 = sshra.s32 (!%p2245_p7), %s3126_s23, 4 }
 0x14c   : > { %903 = sbr.rel (%p2245_p7) target bundleno = 933 (0x3a5), region = 44  ;;  %1192 = vmatprep.mubr.bf16.mxu1 (!%p2245_p7), %v2950_v62  ;;  %v2951_v12 = vld [vmem:[%s3131_s28 + $0x24] ss:$16 sps:$4 sm:$0xff] (!%p2245_p7)   ;;  %v2953_v19 = vld [vmem:[%s3131_s28 + $0x20] ss:$16 sps:$4 sm:$0xff] (!%p2245_p7)   ;;  %v2999_v24 = vld [vmem:[%s3534_s2 + $0x58] sm:$0xff] (!%p2245_p7)  }
 0x14d   : > { %v2996_v15 = vld [vmem:[%s3534_s2 + $0x40] sm:$0xff] (!%p2245_p7)   ;;  %v2998_v20 = vld [vmem:[%s3534_s2 + $0x50] sm:$0xff] (!%p2245_p7)   ;;  %v2974_v45 = vld [vmem:[%s3131_s28 + $0xc] ss:$16 sps:$4 sm:$0xff] (!%p2245_p7)   ;;  %s2247_s29 = sshll.u32 (!%p2245_p7), %s924_s27, 3  ;;  %s904_s27 = sshra.s32 (!%p2245_p7), %s3126_s23, 3 }
 0x14e   : > { %2699 = vmatprep.subr.bf16.mxu0 (!%p2245_p7), %v2996_v15  ;;  %v2954_v21 = vld [vmem:[%s3131_s28 + $0x44] ss:$16 sps:$4 sm:$0xff] (!%p2245_p7)   ;;  %v2956_v27 = vld [vmem:[%s3131_s28 + $0x40] ss:$16 sps:$4 sm:$0xff] (!%p2245_p7)   ;;  %v2972_v46 = vld [vmem:[%s3131_s28 + $0x8] ss:$16 sps:$4 sm:$0xff] (!%p2245_p7)  }
 0x14f   : > { %2700 = vmatpush3.bf16.msra.mxu0 (!%p2245_p7), %v2996_v15  ;;  %v2957_v28 = vld [vmem:[%s3131_s28 + $0x64] ss:$16 sps:$4 sm:$0xff] (!%p2245_p7)   ;;  %v2959_v33 = vld [vmem:[%s3131_s28 + $0x60] ss:$16 sps:$4 sm:$0xff] (!%p2245_p7)   ;;  %v2975_v47 = vld [vmem:[%s3131_s28 + $0x2c] ss:$16 sps:$4 sm:$0xff] (!%p2245_p7)  }
 0x150   : > { %v976_v57 = vld [vmem:[#allocation2 + $0x40] sm:$0xff] (!%p2245_p7)  ;;  %v977_v59 = vld [vmem:[#allocation2 + $0x48] sm:$0xff] (!%p2245_p7)  ;;  %v978_v61 = vld [vmem:[#allocation2 + $0x50] sm:$0xff] (!%p2245_p7)  ;;  %2701 = vmatprep.subr.bf16.mxu0 (!%p2245_p7), %v2997_v17  ;;  %s3347_s16 = scalar_lea.vmem (!%p2245_p7), [#allocation2], %s2247_s29  ;;  %s2246_s29 = sshll.u32 (!%p2245_p7), %s904_s27, 2 }
 0x151   : > { %v968_v58 = vld [vmem:[#allocation2] sm:$0xff] (!%p2245_p7)  ;;  %2523 = vmatprep.subr.bf16.mxu1 (!%p2245_p7), %v976_v57  ;;  %v969_v60 = vld [vmem:[#allocation2 + $0x8] sm:$0xff] (!%p2245_p7)  ;;  %v970_v63 = vld [vmem:[#allocation2 + $0x10] sm:$0xff] (!%p2245_p7)  ;;  %s3390_s7 = scalar_lea.vmem (!%p2245_p7), %s3533_s1, %s2246_s29 }
 0x152   : > { %2524 = vmatpush3.bf16.msra.mxu1 (!%p2245_p7), %v968_v58  ;;  %v979_v0 = vld [vmem:[#allocation2 + $0x58] sm:$0xff] (!%p2245_p7)  ;;  %v980_v2 = vld [vmem:[#allocation2 + $0x60] sm:$0xff] (!%p2245_p7)  ;;  %v981_v4 = vld [vmem:[#allocation2 + $0x68] sm:$0xff] (!%p2245_p7) }
 0x153   : > { %2525 = vmatprep.subr.bf16.mxu1 %v977_v59  ;;  %v971_v1 = vld [vmem:[#allocation2 + $0x18] sm:$0xff]  ;;  %v972_v3 = vld [vmem:[#allocation2 + $0x20] sm:$0xff]  ;;  %v973_v5 = vld [vmem:[#allocation2 + $0x28] sm:$0xff]  ;;  %2702 = vmatpush3.bf16.msra.mxu0 %v2997_v17 }
 0x154   : > { %v982_v6 = vld [vmem:[#allocation2 + $0x70] sm:$0xff]  ;;  %v983_v8 = vld [vmem:[#allocation2 + $0x78] sm:$0xff]  ;;  %v992_v10 = vld [vmem:[#allocation2 + $0xc0] sm:$0xff]  ;;  %2703 = vmatprep.subr.bf16.mxu0 %v2998_v20 }
 0x155   : > { %v974_v7 = vld [vmem:[#allocation2 + $0x30] sm:$0xff]  ;;  %v975_v9 = vld [vmem:[#allocation2 + $0x38] sm:$0xff]  ;;  %v984_v13 = vld [vmem:[#allocation2 + $0x80] sm:$0xff] }
 0x156   : > { %2526 = vmatpush3.bf16.msra.mxu1 %v969_v60  ;;  %v993_v14 = vld [vmem:[#allocation2 + $0xc8] sm:$0xff]  ;;  %v994_v18 = vld [vmem:[#allocation2 + $0xd0] sm:$0xff]  ;;  %v995_v23 = vld [vmem:[#allocation2 + $0xd8] sm:$0xff] }
 0x157   : > { %2527 = vmatprep.subr.bf16.mxu1 %v978_v61  ;;  %v985_v16 = vld [vmem:[#allocation2 + $0x88] sm:$0xff]  ;;  %v986_v22 = vld [vmem:[#allocation2 + $0x90] sm:$0xff]  ;;  %v987_v25 = vld [vmem:[#allocation2 + $0x98] sm:$0xff]  ;;  %2704 = vmatpush3.bf16.msra.mxu0 %v2998_v20 }
 0x158   : > { %v996_v26 = vld [vmem:[#allocation2 + $0xe0] sm:$0xff]  ;;  %2705 = vmatprep.subr.bf16.mxu0 %v2999_v24  ;;  %v997_v30 = vld [vmem:[#allocation2 + $0xe8] sm:$0xff]  ;;  %v998_v32 = vld [vmem:[#allocation2 + $0xf0] sm:$0xff] }
 0x159   : > { %v988_v29 = vld [vmem:[#allocation2 + $0xa0] sm:$0xff]  ;;  %v989_v31 = vld [vmem:[#allocation2 + $0xa8] sm:$0xff]  ;;  %v990_v35 = vld [vmem:[#allocation2 + $0xb0] sm:$0xff] }
 0x15a   : > { %2528 = vmatpush3.bf16.msra.mxu1 %v970_v63  ;;  %v2960_v34 = vld [vmem:[%s3131_s28 + $0x84] ss:$16 sps:$4 sm:$0xff]   ;;  %v999_v36 = vld [vmem:[#allocation2 + $0xf8] sm:$0xff]  ;;  %v2962_v38 = vld [vmem:[%s3131_s28 + $0x80] ss:$16 sps:$4 sm:$0xff]  }
 0x15b   : > { %2529 = vmatprep.subr.bf16.mxu1 %v979_v0  ;;  %2706 = vmatpush3.bf16.msra.mxu0 %v2999_v24  ;;  %v991_v37 = vld [vmem:[#allocation2 + $0xb8] sm:$0xff]  ;;  %v2963_v39 = vld [vmem:[%s3131_s28 + $0xa4] ss:$16 sps:$4 sm:$0xff]   ;;  %v2965_v40 = vld [vmem:[%s3131_s28 + $0xa0] ss:$16 sps:$4 sm:$0xff]  }
 0x15c   : > { %v2966_v41 = vld [vmem:[%s3131_s28 + $0xc4] ss:$16 sps:$4 sm:$0xff]   ;;  %v2968_v42 = vld [vmem:[%s3131_s28 + $0xc0] ss:$16 sps:$4 sm:$0xff]   ;;  %v2977_v48 = vld [vmem:[%s3131_s28 + $0x28] ss:$16 sps:$4 sm:$0xff]  }
 0x15d   : > { %v2969_v43 = vld [vmem:[%s3131_s28 + $0xe4] ss:$16 sps:$4 sm:$0xff]   ;;  %v2971_v44 = vld [vmem:[%s3131_s28 + $0xe0] ss:$16 sps:$4 sm:$0xff]   ;;  %v2978_v49 = vld [vmem:[%s3131_s28 + $0x4c] ss:$16 sps:$4 sm:$0xff]  }
 0x15e   : > { %2530 = vmatpush3.bf16.msra.mxu1 %v971_v1  ;;  %v2980_v50 = vld [vmem:[%s3131_s28 + $0x48] ss:$16 sps:$4 sm:$0xff]   ;;  %v2981_v51 = vld [vmem:[%s3131_s28 + $0x6c] ss:$16 sps:$4 sm:$0xff]   ;;  %v3000_v52 = vld [vmem:[%s3534_s2 + $0x60] sm:$0xff]  }
 0x15f   : > { %2531 = vmatprep.subr.bf16.mxu1 %v980_v2  ;;  %v2983_v53 = vld [vmem:[%s3131_s28 + $0x68] ss:$16 sps:$4 sm:$0xff]   ;;  %2707 = vmatprep.subr.bf16.mxu0 %v3000_v52  ;;  %v2984_v54 = vld [vmem:[%s3131_s28 + $0x8c] ss:$16 sps:$4 sm:$0xff]   ;;  %v3002_v56 = vld [vmem:[%s3534_s2 + $0x70] sm:$0xff]  }
 0x160   : > { %2708 = vmatpush3.bf16.msra.mxu0 %v3000_v52  ;;  %v3001_v55 = vld [vmem:[%s3534_s2 + $0x68] sm:$0xff]   ;;  %v3003_v59 = vld [vmem:[%s3534_s2 + $0x78] sm:$0xff]   ;;  %v928_v60 = vld [vmem:[%s3347_s16] sm:$0xff] }
 0x161   : > { %2709 = vmatprep.subr.bf16.mxu0 %v3001_v55  ;;  %v2986_v57 = vld [vmem:[%s3131_s28 + $0x88] ss:$16 sps:$4 sm:$0xff]   ;;  %v2987_v58 = vld [vmem:[%s3131_s28 + $0xac] ss:$16 sps:$4 sm:$0xff]   ;;  %v3004_v61 = vld [vmem:[%s3534_s2] sm:$0xff]   ;;  %2715 = vmatprep.mubr.bf16.mxu0 %v928_v60 }
 0x162   : > { %2532 = vmatpush3.bf16.msra.mxu1 %v972_v3  ;;  %v929_v62 = vld [vmem:[%s3347_s16 + $0x8] sm:$0xff]  ;;  %v930_v2 = vld [vmem:[%s3347_s16 + $0x10] sm:$0xff]  ;;  %v935_v15 = vld [vmem:[%s3347_s16 + $0x38] sm:$0xff] }
 0x163   : > { %2533 = vmatprep.subr.bf16.mxu1 %v981_v4  ;;  %v2989_v63 = vld [vmem:[%s3131_s28 + $0xa8] ss:$16 sps:$4 sm:$0xff]   ;;  %v2990_v0 = vld [vmem:[%s3131_s28 + $0xcc] ss:$16 sps:$4 sm:$0xff]   ;;  %v3006_v3 = vld [vmem:[%s3534_s2 + $0x10] sm:$0xff]  }
 0x164   : > { %2710 = vmatpush3.bf16.msra.mxu0 %v3001_v55  ;;  %v3005_v1 = vld [vmem:[%s3534_s2 + $0x8] sm:$0xff]   ;;  %v931_v4 = vld [vmem:[%s3347_s16 + $0x18] sm:$0xff]  ;;  %v3012_v17 = vld [vmem:[%s3390_s7] sm:$0xff]  }
 0x165   : > { %2711 = vmatprep.subr.bf16.mxu0 %v3002_v56  ;;  %v3015_v20 = vld [vmem:[%s3534_s2 + $0x88] sm:$0xff]   ;;  %v3019_v24 = vld [vmem:[%s3534_s2 + $0x98] sm:$0xff]  }
 0x166   : > { %2534 = vmatpush3.bf16.msra.mxu1 %v973_v5  ;;  %v2992_v5 = vld [vmem:[%s3131_s28 + $0xc8] ss:$16 sps:$4 sm:$0xff]  }
 0x167   : > { %2535 = vmatprep.subr.bf16.mxu1 %v982_v6  ;;  %v2993_v6 = vld [vmem:[%s3131_s28 + $0xec] ss:$16 sps:$4 sm:$0xff]  }
 0x168   : > { %2712 = vmatpush3.bf16.msra.mxu0 %v3002_v56 }
 0x169   : > { %2713 = vmatprep.subr.bf16.mxu0 %v3003_v59 }
 0x16a   : > { %2536 = vmatpush3.bf16.msra.mxu1 %v974_v7  ;;  %v3007_v7 = vld [vmem:[%s3534_s2 + $0x18] sm:$0xff]  }
 0x16b   : > { %2537 = vmatprep.subr.bf16.mxu1 %v983_v8  ;;  %v932_v8 = vld [vmem:[%s3347_s16 + $0x20] sm:$0xff] }
 0x16c   : > { %2714 = vmatpush3.bf16.msra.mxu0 %v3003_v59 }
 0x16d   : > { %2731 = vmatprep.subr.bf16.mxu0 %v3004_v61 }
 0x16e   : > { %2538 = vmatpush3.bf16.msra.mxu1 %v975_v9  ;;  %v3008_v9 = vld [vmem:[%s3534_s2 + $0x20] sm:$0xff]  }
 0x16f   : > { %2587 = vmatprep.subr.bf16.mxu1 %v992_v10  ;;  %2716 = vmatmul.mubr.bf16.vlgmr.msra.gmra.mrb[0].mxu0 %v929_v62  ;;  %v933_v10 = vld [vmem:[%s3347_s16 + $0x28] sm:$0xff] }
 0x170   : > { %2732 = vmatpush3.bf16.msra.mxu0 %v3004_v61  ;;  %2719 = vmatprep.mubr.bf16.mxu0 %v930_v2 }
 0x171   : > { %1193 = vmatmul.mubr.bf16.vlgmr.msra.gmra.mrb[0].mxu1 %v2948_v11  ;;  %2733 = vmatprep.subr.bf16.mxu0 %v3005_v1  ;;  %v2995_v11 = vld [vmem:[%s3131_s28 + $0xe8] ss:$16 sps:$4 sm:$0xff]  }
 0x172   : > { %2588 = vmatpush3.bf16.msra.mxu1 %v984_v13  ;;  %1200 = vmatprep.mubr.bf16.mxu1 %v2951_v12  ;;  %v3009_v12 = vld [vmem:[%s3534_s2 + $0x28] sm:$0xff]   ;;  %v934_v13 = vld [vmem:[%s3347_s16 + $0x30] sm:$0xff] }
 0x173   : > { %2589 = vmatprep.subr.bf16.mxu1 %v993_v14  ;;  %v3010_v14 = vld [vmem:[%s3534_s2 + $0x30] sm:$0xff]  }
 0x174   : > { %2734 = vmatpush3.bf16.msra.mxu0 %v3005_v1 }
 0x175   : > { %2735 = vmatprep.subr.bf16.mxu0 %v3006_v3 }
 0x176   : > { %2590 = vmatpush3.bf16.msra.mxu1 %v985_v16  ;;  %v3011_v16 = vld [vmem:[%s3534_s2 + $0x38] sm:$0xff]  }
 0x177   : > { %2591 = vmatprep.subr.bf16.mxu1 %v994_v18  ;;  %2720 = vmatmul.mubr.bf16.gmra.mrb[4].mxu0 %v931_v4  ;;  %v3013_v18 = vld [vmem:[%s3390_s7 + $0x8] sm:$0xff]  }
 0x178   : > { %2736 = vmatpush3.bf16.msra.mxu0 %v3006_v3  ;;  %2723 = vmatprep.mubr.bf16.mxu0 %v932_v8 }
 0x179   : > { %1201 = vmatmul.mubr.bf16.gmra.mrb[4].mxu1 %v2953_v19  ;;  %2737 = vmatprep.subr.bf16.mxu0 %v3007_v7  ;;  %v3014_v19 = vld [vmem:[%s3534_s2 + $0x80] sm:$0xff]  }
 0x17a   : > { %1208 = vmatprep.mubr.bf16.mxu1 %v2954_v21  ;;  %2592 = vmatpush3.bf16.msra.mxu1 %v986_v22  ;;  %v3016_v21 = vld [vmem:[%s3390_s7 + $0x10] sm:$0xff]   ;;  %v3017_v22 = vld [vmem:[%s3390_s7 + $0x18] sm:$0xff]  }
 0x17b   : > { %2593 = vmatprep.subr.bf16.mxu1 %v995_v23  ;;  %v3018_v23 = vld [vmem:[%s3534_s2 + $0x90] sm:$0xff]  }
 0x17c   : > { %2738 = vmatpush3.bf16.msra.mxu0 %v3007_v7 }
 0x17d   : > { %2739 = vmatprep.subr.bf16.mxu0 %v3008_v9 }
 0x17e   : > { %2594 = vmatpush3.bf16.msra.mxu1 %v987_v25  ;;  %v3020_v25 = vld [vmem:[%s3390_s7 + $0x20] sm:$0xff]  }
 0x17f   : > { %2595 = vmatprep.subr.bf16.mxu1 %v996_v26  ;;  %2724 = vmatmul.mubr.bf16.gmra.mrb[8].mxu0 %v933_v10  ;;  %v3021_v26 = vld [vmem:[%s3390_s7 + $0x28] sm:$0xff]  }
 0x180   : > { %2740 = vmatpush3.bf16.msra.mxu0 %v3008_v9  ;;  %2727 = vmatprep.mubr.bf16.mxu0 %v934_v13 }
 0x181   : > { %1209 = vmatmul.mubr.bf16.gmra.mrb[8].mxu1 %v2956_v27  ;;  %2741 = vmatprep.subr.bf16.mxu0 %v3009_v12  ;;  %v3022_v27 = vld [vmem:[%s3534_s2 + $0xa0] sm:$0xff]  }
 0x182   : > { %1216 = vmatprep.mubr.bf16.mxu1 %v2957_v28  ;;  %2596 = vmatpush3.bf16.msra.mxu1 %v988_v29  ;;  %v3023_v28 = vld [vmem:[%s3534_s2 + $0xa8] sm:$0xff]   ;;  %v3024_v29 = vld [vmem:[%s3390_s7 + $0x30] sm:$0xff]  }
 0x183   : > { %2597 = vmatprep.subr.bf16.mxu1 %v997_v30  ;;  %v3025_v30 = vld [vmem:[%s3390_s7 + $0x38] sm:$0xff]  }
 0x184   : > { %2742 = vmatpush3.bf16.msra.mxu0 %v3009_v12 }
 0x185   : > { %2743 = vmatprep.subr.bf16.mxu0 %v3010_v14 }
 0x186   : > { %2598 = vmatpush3.bf16.msra.mxu1 %v989_v31  ;;  %v3026_v31 = vld [vmem:[%s3534_s2 + $0xb0] sm:$0xff]  }
 0x187   : > { %2599 = vmatprep.subr.bf16.mxu1 %v998_v32  ;;  %2728 = vmatmul.mubr.bf16.gmra.mrb[12].mxu0 %v935_v15  ;;  %v3027_v32 = vld [vmem:[%s3534_s2 + $0xb8] sm:$0xff]  }
 0x188   : > { %2744 = vmatpush3.bf16.msra.mxu0 %v3010_v14  ;;  %2747 = vmatprep.mubr.bf16.mxu0 %v3012_v17 }
 0x189   : > { %1217 = vmatmul.mubr.bf16.gmra.mrb[12].mxu1 %v2959_v33  ;;  %2745 = vmatprep.subr.bf16.mxu0 %v3011_v16 }
 0x18a   : > { %1224 = vmatprep.mubr.bf16.mxu1 %v2960_v34  ;;  %2600 = vmatpush3.bf16.msra.mxu1 %v990_v35 }
 0x18b   : > { %2601 = vmatprep.subr.bf16.mxu1 %v999_v36 }
 0x18c   : > { %2746 = vmatpush3.bf16.msra.mxu0 %v3011_v16 }
 0x18d   : > { %2763 = vmatprep.subr.bf16.mxu0 %v3014_v19 }
 0x18e   : > { %2602 = vmatpush3.bf16.msra.mxu1 %v991_v37 }
 0x18f   : > { %2748 = vmatmul.mubr.bf16.vlgmr.msra.gmra.mrb[0].mxu0 %v3013_v18 }
 0x190   : > { %2764 = vmatpush3.bf16.msra.mxu0 %v3014_v19  ;;  %2751 = vmatprep.mubr.bf16.mxu0 %v3016_v21 }
 0x191   : > { %1225 = vmatmul.mubr.bf16.gmra.mrb[16].mxu1 %v2962_v38  ;;  %2765 = vmatprep.subr.bf16.mxu0 %v3015_v20 }
 0x192   : > { %1232 = vmatprep.mubr.bf16.mxu1 %v2963_v39 }
 0x194   : > { %2766 = vmatpush3.bf16.msra.mxu0 %v3015_v20 }
 0x195   : > { %2767 = vmatprep.subr.bf16.mxu0 %v3018_v23 }
 0x197   : > { %2752 = vmatmul.mubr.bf16.gmra.mrb[4].mxu0 %v3017_v22 }
 0x198   : > { %2768 = vmatpush3.bf16.msra.mxu0 %v3018_v23  ;;  %2755 = vmatprep.mubr.bf16.mxu0 %v3020_v25 }
 0x199   : > { %1233 = vmatmul.mubr.bf16.gmra.mrb[20].mxu1 %v2965_v40  ;;  %2769 = vmatprep.subr.bf16.mxu0 %v3019_v24 }
 0x19a   : > { %1240 = vmatprep.mubr.bf16.mxu1 %v2966_v41 }
 0x19c   : > { %2770 = vmatpush3.bf16.msra.mxu0 %v3019_v24 }
 0x19d   : > { %2771 = vmatprep.subr.bf16.mxu0 %v3022_v27 }
 0x19f   : > { %2756 = vmatmul.mubr.bf16.gmra.mrb[8].mxu0 %v3021_v26 }
 0x1a0   : > { %2772 = vmatpush3.bf16.msra.mxu0 %v3022_v27  ;;  %2759 = vmatprep.mubr.bf16.mxu0 %v3024_v29 }
 0x1a1   : > { %1241 = vmatmul.mubr.bf16.gmra.mrb[24].mxu1 %v2968_v42  ;;  %2773 = vmatprep.subr.bf16.mxu0 %v3023_v28 }
 0x1a2   : > { %1248 = vmatprep.mubr.bf16.mxu1 %v2969_v43 }
 0x1a4   : > { %2774 = vmatpush3.bf16.msra.mxu0 %v3023_v28 }
 0x1a5   : > { %2775 = vmatprep.subr.bf16.mxu0 %v3026_v31 }
 0x1a7   : > { %2760 = vmatmul.mubr.bf16.gmra.mrb[12].mxu0 %v3025_v30 }
 0x1a8   : > { %2776 = vmatpush3.bf16.msra.mxu0 %v3026_v31 }
 0x1a9   : > { %1249 = vmatmul.mubr.bf16.gmra.mrb[28].mxu1 %v2971_v44  ;;  %2777 = vmatprep.subr.bf16.mxu0 %v3027_v32 }
 0x1aa   : > { %1289 = vmatprep.mubr.bf16.mxu1 %v2974_v45 }
 0x1ac   : > { %2778 = vmatpush3.bf16.msra.mxu0 %v3027_v32 }
 0x1b1   : > { %1290 = vmatmul.mubr.bf16.vlgmr.msra.gmra.mrb[32].mxu1 %v2972_v46 }
 0x1b2   : > { %1297 = vmatprep.mubr.bf16.mxu1 %v2975_v47 }
 0x1b9   : > { %1298 = vmatmul.mubr.bf16.gmra.mrb[36].mxu1 %v2977_v48 }
 0x1ba   : > { %1305 = vmatprep.mubr.bf16.mxu1 %v2978_v49 }
 0x1c1   : > { %1306 = vmatmul.mubr.bf16.gmra.mrb[40].mxu1 %v2980_v50 }
 0x1c2   : > { %1313 = vmatprep.mubr.bf16.mxu1 %v2981_v51 }
 0x1c9   : > { %1314 = vmatmul.mubr.bf16.gmra.mrb[44].mxu1 %v2983_v53 }
 0x1ca   : > { %1321 = vmatprep.mubr.bf16.mxu1 %v2984_v54 }
 0x1d1   : > { %1322 = vmatmul.mubr.bf16.gmra.mrb[48].mxu1 %v2986_v57 }
 0x1d2   : > { %1329 = vmatprep.mubr.bf16.mxu1 %v2987_v58 }
 0x1d9   : > { %1330 = vmatmul.mubr.bf16.gmra.mrb[52].mxu1 %v2989_v63 }
 0x1da   : > { %1337 = vmatprep.mubr.bf16.mxu1 %v2990_v0 }
 0x1e1   : > { %1338 = vmatmul.mubr.bf16.gmra.mrb[56].mxu1 %v2992_v5 }
 0x1e2   : > { %1345 = vmatprep.mubr.bf16.mxu1 %v2993_v6 }
 0x1e9   : > { %1346 = vmatmul.mubr.bf16.gmra.mrb[60].mxu1 %v2995_v11 }
 0x244   : > { %v2539_v33 = vpop.f32.mrb[0].mxu1 }
 0x245   : > { %v2540_v34 = vpop.f32.mrb[1].mxu1 }
 0x246   : > { %v2541_v35 = vadd.f32 %v2540_v34, %v2539_v33  ;;  %v2542_v36 = vpop.f32.mrb[2].mxu1 }
 0x247   : > { %v2543_v37 = vpop.f32.mrb[3].mxu1 }
 0x248   : > { %v2544_v38 = vadd.f32 %v2543_v37, %v2542_v36 }
 0x24c   : > { %v2545_v39 = vpop.f32.mrb[4].mxu1 }
 0x24d   : > { %v2546_v40 = vpop.f32.mrb[5].mxu1 }
 0x24e   : > { %v2547_v41 = vadd.f32 %v2546_v40, %v2545_v39  ;;  %v2548_v42 = vpop.f32.mrb[6].mxu1 }
 0x24f   : > { %v2549_v43 = vpop.f32.mrb[7].mxu1 }
 0x250   : > { %v2550_v44 = vadd.f32 %v2549_v43, %v2548_v42 }
 0x254   : > { %v2551_v45 = vpop.f32.mrb[8].mxu1 }
 0x255   : > { %v2552_v46 = vpop.f32.mrb[9].mxu1 }
 0x256   : > { %v2553_v47 = vadd.f32 %v2552_v46, %v2551_v45  ;;  %v2554_v48 = vpop.f32.mrb[10].mxu1 }
 0x257   : > { %v2555_v49 = vpop.f32.mrb[11].mxu1 }
 0x258   : > { %v2556_v50 = vadd.f32 %v2555_v49, %v2554_v48 }
 0x25c   : > { %v2557_v51 = vpop.f32.mrb[12].mxu1 }
 0x25d   : > { %v2558_v52 = vpop.f32.mrb[13].mxu1 }
 0x25e   : > { %v3424_v53 = vadd.f32 %v2558_v52, %v2557_v51  ;;  %v2560_v54 = vpop.f32.mrb[14].mxu1 }
 0x25f   : > { %v2561_v55 = vpop.f32.mrb[15].mxu1 }
 0x260   : > { %v2562_v56 = vadd.f32 %v2561_v55, %v2560_v54 }
 0x264   : > { %v2563_v57 = vpop.f32.mrb[16].mxu1 }
 0x265   : > { %v2564_v58 = vpop.f32.mrb[17].mxu1 }
 0x266   : > { %v3426_v59 = vadd.f32 %v2564_v58, %v2563_v57  ;;  %v2566_v60 = vpop.f32.mrb[18].mxu1 }
 0x267   : > { %v2567_v61 = vpop.f32.mrb[19].mxu1 }
 0x268   : > { %v3428_v62 = vadd.f32 %v2567_v61, %v2566_v60 }
 0x26c   : > { %v2569_v63 = vpop.f32.mrb[20].mxu1 }
 0x26d   : > { %v2570_v0 = vpop.f32.mrb[21].mxu1 }
 0x26e   : > { %v3430_v1 = vadd.f32 %v2570_v0, %v2569_v63  ;;  %v2572_v2 = vpop.f32.mrb[22].mxu1 }
 0x26f   : > { %v2573_v3 = vpop.f32.mrb[23].mxu1 }
 0x270   : > { %v3432_v4 = vadd.f32 %v2573_v3, %v2572_v2 }
 0x274   : > { %v2575_v5 = vpop.f32.mrb[24].mxu1 }
 0x275   : > { %v2576_v6 = vpop.f32.mrb[25].mxu1 }
 0x276   : > { %v3434_v7 = vadd.f32 %v2576_v6, %v2575_v5  ;;  %v2578_v8 = vpop.f32.mrb[26].mxu1 }
 0x277   : > { %v2579_v9 = vpop.f32.mrb[27].mxu1 }
 0x278   : > { %v3436_v10 = vadd.f32 %v2579_v9, %v2578_v8 }
 0x27c   : > { %v2581_v11 = vpop.f32.mrb[28].mxu1 }
 0x27d   : > { %v2582_v12 = vpop.f32.mrb[29].mxu1 }
 0x27e   : > { %v3438_v13 = vadd.f32 %v2582_v12, %v2581_v11  ;;  %v2584_v14 = vpop.f32.mrb[30].mxu1 }
 0x27f   : > { %v2585_v15 = vpop.f32.mrb[31].mxu1 }
 0x280   : > { %v3440_v16 = vadd.f32 %v2585_v15, %v2584_v14 }
 0x284   : > { %v2603_v17 = vpop.f32.mrb[32].mxu1 }
 0x285   : > { %v2604_v18 = vpop.f32.mrb[33].mxu1 }
 0x286   : > { %v2605_v19 = vadd.f32 %v2604_v18, %v2603_v17  ;;  %v2606_v20 = vpop.f32.mrb[34].mxu1 }
 0x287   : > { %v2607_v21 = vpop.f32.mrb[35].mxu1 }
 0x288   : > { %v1292_v22 = vadd.f32 %v2605_v19, %v2541_v35  ;;  %v2608_v23 = vadd.f32 %v2607_v21, %v2606_v20 }
 0x28a   : > { %v1295_v24 = vadd.f32 %v2608_v23, %v2544_v38 }
 0x28c   : > { %v2609_v25 = vpop.f32.mrb[36].mxu1  ;;  %v1354_v26 = vpack.c.bf16 %v1295_v24, %v1292_v22 }
 0x28d   : > { %v2610_v27 = vpop.f32.mrb[37].mxu1 }
 0x28e   : > { %v2611_v28 = vadd.f32 %v2610_v27, %v2609_v25  ;;  %v2612_v29 = vpop.f32.mrb[38].mxu1  ;;  %2779 = vmatprep.mubr.bf16.mxu0 %v1354_v26 }
 0x28f   : > { %v2613_v30 = vpop.f32.mrb[39].mxu1 }
 0x290   : > { %v1300_v31 = vadd.f32 %v2611_v28, %v2547_v41  ;;  %v2614_v32 = vadd.f32 %v2613_v30, %v2612_v29  ;;  %v1948_v29 = vlaneseq }
 0x292   : > { %v1303_v33 = vadd.f32 %v2614_v32, %v2550_v44 }
 0x294   : > { %v1355_v34 = vpack.c.bf16 %v1303_v33, %v1300_v31  ;;  %v2615_v36 = vpop.f32.mrb[40].mxu1  ;;  %v3456_v31 = vstv %s3126_s23 }
 0x295   : > { %v2616_v37 = vpop.f32.mrb[41].mxu1 }
 0x296   : > { %v2617_v39 = vadd.f32 %v2616_v37, %v2615_v36  ;;  %v2618_v40 = vpop.f32.mrb[42].mxu1  ;;  %2780 = vmatmul.mubr.bf16.vlgmr.msra.gmra.mrb[0].mxu0 %v1355_v34 }
 0x297   : > { %v2619_v42 = vpop.f32.mrb[43].mxu1 }
 0x298   : > { %v1308_v35 = vadd.f32 %v2617_v39, %v2553_v47  ;;  %v2620_v43 = vadd.f32 %v2619_v42, %v2618_v40 }
 0x29a   : > { %v1311_v38 = vadd.f32 %v2620_v43, %v2556_v50 }
 0x29c   : > { %v2621_v45 = vpop.f32.mrb[44].mxu1  ;;  %v1356_v46 = vpack.c.bf16 %v1311_v38, %v1308_v35 }
 0x29d   : > { %v2622_v48 = vpop.f32.mrb[45].mxu1 }
 0x29e   : > { %v2623_v49 = vadd.f32 %v2622_v48, %v2621_v45  ;;  %v2624_v51 = vpop.f32.mrb[46].mxu1  ;;  %2783 = vmatprep.mubr.bf16.mxu0 %v1356_v46 }
 0x29f   : > { %v2625_v52 = vpop.f32.mrb[47].mxu1 }
 0x2a0   : > { %v1316_v41 = vadd.f32 %v2623_v49, %v3424_v53  ;;  %v2626_v44 = vadd.f32 %v2625_v52, %v2624_v51 }
 0x2a2   : > { %v1319_v54 = vadd.f32 %v2626_v44, %v2562_v56 }
 0x2a4   : > { %v2627_v55 = vpop.f32.mrb[48].mxu1  ;;  %v1357_v57 = vpack.c.bf16 %v1319_v54, %v1316_v41 }
 0x2a5   : > { %v2628_v58 = vpop.f32.mrb[49].mxu1 }
 0x2a6   : > { %v2629_v60 = vadd.f32 %v2628_v58, %v2627_v55  ;;  %v2630_v61 = vpop.f32.mrb[50].mxu1  ;;  %2784 = vmatmul.mubr.bf16.gmra.mrb[4].mxu0 %v1357_v57 }
 0x2a7   : > { %v2631_v47 = vpop.f32.mrb[51].mxu1 }
 0x2a8   : > { %v1324_v50 = vadd.f32 %v2629_v60, %v3426_v59  ;;  %v2632_v63 = vadd.f32 %v2631_v47, %v2630_v61 }
 0x2aa   : > { %v1327_v0 = vadd.f32 %v2632_v63, %v3428_v62 }
 0x2ac   : > { %v2633_v2 = vpop.f32.mrb[52].mxu1  ;;  %v1358_v3 = vpack.c.bf16 %v1327_v0, %v1324_v50 }
 0x2ad   : > { %v2634_v5 = vpop.f32.mrb[53].mxu1 }
 0x2ae   : > { %v2635_v6 = vadd.f32 %v2634_v5, %v2633_v2  ;;  %v2636_v8 = vpop.f32.mrb[54].mxu1  ;;  %2787 = vmatprep.mubr.bf16.mxu0 %v1358_v3 }
 0x2af   : > { %v2637_v53 = vpop.f32.mrb[55].mxu1 }
 0x2b0   : > { %v1332_v56 = vadd.f32 %v2635_v6, %v3430_v1  ;;  %v2638_v9 = vadd.f32 %v2637_v53, %v2636_v8 }
 0x2b2   : > { %v1335_v11 = vadd.f32 %v2638_v9, %v3432_v4 }
 0x2b4   : > { %v2639_v12 = vpop.f32.mrb[56].mxu1  ;;  %v1359_v14 = vpack.c.bf16 %v1335_v11, %v1332_v56 }
 0x2b5   : > { %v2640_v15 = vpop.f32.mrb[57].mxu1 }
 0x2b6   : > { %v2641_v17 = vadd.f32 %v2640_v15, %v2639_v12  ;;  %v2642_v59 = vpop.f32.mrb[58].mxu1  ;;  %2788 = vmatmul.mubr.bf16.gmra.mrb[8].mxu0 %v1359_v14 }
 0x2b7   : > { %v2643_v18 = vpop.f32.mrb[59].mxu1 }
 0x2b8   : > { %v1340_v62 = vadd.f32 %v2641_v17, %v3434_v7  ;;  %v2644_v19 = vadd.f32 %v2643_v18, %v2642_v59  ;;  %v3451_v7 = vshrl.u32 %v1948_v29, 7 }
 0x2ba   : > { %v1343_v20 = vadd.f32 %v2644_v19, %v3436_v10  ;;  %v1951_v10 = vadd.s32 16, %v3451_v7  ;;  %v1952_v30 = vadd.s32 24, %v3451_v7  ;;  %v1950_v32 = vadd.s32 8, %v3451_v7 }
 0x2bb   : > { %v1966_v39 = vadd.s32 %v3456_v31, %v3451_v7  ;;  %v1955_v58 = vadd.s32 48, %v3451_v7  ;;  %v1956_v60 = vadd.s32 56, %v3451_v7  ;;  %v1953_v61 = vadd.s32 32, %v3451_v7 }
 0x2bc   : > { %v2645_v21 = vpop.f32.mrb[60].mxu1  ;;  %v1360_v22 = vpack.c.bf16 %v1343_v20, %v1340_v62  ;;  %v1969_v34 = vadd.s32 %v3456_v31, %v1952_v30  ;;  %v1967_v40 = vadd.s32 %v3456_v31, %v1950_v32  ;;  %v1954_v47 = vadd.s32 40, %v3451_v7 }
 0x2bd   : > { %v2646_v23 = vpop.f32.mrb[61].mxu1  ;;  %vm1982_vm2 = vcmp.lt.s32.totalorder %v1966_v39, 512  ;;  %v1972_v63 = vadd.s32 %v3456_v31, %v1955_v58  ;;  %v1973_v0 = vadd.s32 %v3456_v31, %v1956_v60  ;;  %v1970_v5 = vadd.s32 %v3456_v31, %v1953_v61 }
 0x2be   : > { %v2647_v1 = vadd.f32 %v2646_v23, %v2645_v21  ;;  %v2648_v24 = vpop.f32.mrb[62].mxu1  ;;  %2791 = vmatprep.mubr.bf16.mxu0 %v1360_v22  ;;  %vm1985_vm1 = vcmp.lt.s32.totalorder %v1969_v34, 512  ;;  %vm1983_vm3 = vcmp.lt.s32.totalorder %v1967_v40, 512  ;;  %v1971_v6 = vadd.s32 %v3456_v31, %v1954_v47 }
 0x2bf   : > { %v2649_v4 = vpop.f32.mrb[63].mxu1  ;;  %vm1988_vm4 = vcmp.lt.s32.totalorder %v1972_v63, 512  ;;  %vm1989_vm5 = vcmp.lt.s32.totalorder %v1973_v0, 512  ;;  %vm1986_vm6 = vcmp.lt.s32.totalorder %v1970_v5, 512  ;;  %v1959_v22 = vadd.s32 80, %v3451_v7 }
 0x2c0   : > { %v1348_v25 = vadd.f32 %v2647_v1, %v3438_v13  ;;  %v2650_v26 = vadd.f32 %v2649_v4, %v2648_v24  ;;  %v3462_v13 = vld [vmem:[%s3535_s3] ss:$0 sm:$0xff]  ;;  %vm1987_vm7 = vcmp.lt.s32.totalorder %v1971_v6, 512  ;;  %v1960_v23 = vadd.s32 88, %v3451_v7 }
 0x2c1   : > { %v1957_v1 = vadd.s32 64, %v3451_v7  ;;  %v1958_v24 = vadd.s32 72, %v3451_v7 }
 0x2c2   : > { %v1351_v27 = vadd.f32 %v2650_v26, %v3440_v16  ;;  %v1968_v16 = vadd.s32 %v3456_v31, %v1951_v10  ;;  %v1977_v26 = vadd.s32 %v3456_v31, %v1960_v23 }
 0x2c3   : > { %v1974_v29 = vadd.s32 %v3456_v31, %v1957_v1  ;;  %v1975_v10 = vadd.s32 %v3456_v31, %v1958_v24 }
 0x2c4   : > { %v1361_v28 = vpack.c.bf16 %v1351_v27, %v1348_v25  ;;  %vm1984_vm0 = vcmp.lt.s32.totalorder %v1968_v16, 512  ;;  %v1976_v25 = vadd.s32 %v3456_v31, %v1959_v22  ;;  %vm1993_vm9 = vcmp.lt.s32.totalorder %v1977_v26, 512 }
 0x2c5   : > { %vm1990_vm10 = vcmp.lt.s32.totalorder %v1974_v29, 512  ;;  %vm1991_vm11 = vcmp.lt.s32.totalorder %v1975_v10, 512 }
 0x2c6   : > { %2792 = vmatmul.mubr.bf16.gmra.mrb[12].mxu0 %v1361_v28  ;;  %vm1992_vm8 = vcmp.lt.s32.totalorder %v1976_v25, 512 }
 0x369   : > { %v2781_v33 = vpop.f32.mrb[0].mxu0 }
 0x36a   : > { %v1918_v36 = vadd.f32 %v2781_v33, %v3462_v13  ;;  %v1830_v37 = vpop.f32.mrb[1].mxu0 }
 0x36b   : > { %v1916_v42 = vadd.f32 %v3462_v13, %v1830_v37  ;;  %v2782_v35 = vpop.f32.mrb[2].mxu0 }
 0x36c   : > { %v1934_v43 = vmax.f32 %v1918_v36, 0.0  ;;  %v1919_v38 = vadd.f32 %v2782_v35, %v3462_v13  ;;  %v1833_v45 = vpop.f32.mrb[3].mxu0 }
 0x36d   : > { %v1932_v46 = vmax.f32 %v1916_v42, 0.0  ;;  %v1917_v48 = vadd.f32 %v3462_v13, %v1833_v45 }
 0x36e   : > { %v1935_v49 = vmax.f32 %v1919_v38, 0.0  ;;  %v2000_v52 = vsel %vm1984_vm0, %v1934_v43, 0.0 }
 0x36f   : > { %v1933_v51 = vmax.f32 %v1917_v48, 0.0  ;;  %v1998_v44 = vsel %vm1982_vm2, %v1932_v46, 0.0  ;;  %v1963_v48 = vadd.s32 112, %v3451_v7 }
 0x370   : > { %v2001_v41 = vsel %vm1985_vm1, %v1935_v49, 0.0  ;;  %v1964_v49 = vadd.s32 120, %v3451_v7 }
 0x371   : > { %v2356_v54 = vpack.c.bf16 %v2001_v41, %v2000_v52  ;;  %v1999_v55 = vsel %vm1983_vm3, %v1933_v51, 0.0  ;;  %v1961_v51 = vadd.s32 96, %v3451_v7  ;;  %v1962_v52 = vadd.s32 104, %v3451_v7 }
 0x372   : > { %v2351_v57 = vpack.c.bf16 %v1999_v55, %v1998_v44  ;;  %v1980_v44 = vadd.s32 %v3456_v31, %v1963_v48 }
 0x373   : > { %2388 = vst [vmem:[%s3136_s5 + $0x8] sm:$0xff] %v2356_v54   ;;  %v1981_v54 = vadd.s32 %v3456_v31, %v1964_v49  ;;  %v1978_v58 = vadd.s32 %v3456_v31, %v1961_v51  ;;  %v1979_v60 = vadd.s32 %v3456_v31, %v1962_v52 }
 0x374   : > { %2352 = vst [vmem:[%s3136_s5] sm:$0xff] %v2351_v57   ;;  %vm1996_vm12 = vcmp.lt.s32.totalorder %v1980_v44, 512 }
 0x375   : > { %vm1997_vm13 = vcmp.lt.s32.totalorder %v1981_v54, 512  ;;  %vm1994_vm14 = vcmp.lt.s32.totalorder %v1978_v58, 512  ;;  %vm1995_vm15 = vcmp.lt.s32.totalorder %v1979_v60, 512 }
 0x379   : > { %v2785_v50 = vpop.f32.mrb[4].mxu0 }
 0x37a   : > { %v1922_v2 = vadd.f32 %v2785_v50, %v3462_v13  ;;  %v1846_v3 = vpop.f32.mrb[5].mxu0 }
 0x37b   : > { %v1920_v8 = vadd.f32 %v3462_v13, %v1846_v3  ;;  %v2786_v53 = vpop.f32.mrb[6].mxu0 }
 0x37c   : > { %v1938_v56 = vmax.f32 %v1922_v2, 0.0  ;;  %v1923_v9 = vadd.f32 %v2786_v53, %v3462_v13  ;;  %v1849_v11 = vpop.f32.mrb[7].mxu0 }
 0x37d   : > { %v1936_v12 = vmax.f32 %v1920_v8, 0.0  ;;  %v1921_v14 = vadd.f32 %v3462_v13, %v1849_v11 }
 0x37e   : > { %v1939_v15 = vmax.f32 %v1923_v9, 0.0  ;;  %v2004_v59 = vsel %vm1988_vm4, %v1938_v56, 0.0 }
 0x37f   : > { %v1937_v17 = vmax.f32 %v1921_v14, 0.0  ;;  %v2002_v62 = vsel %vm1986_vm6, %v1936_v12, 0.0 }
 0x380   : > { %v2005_v18 = vsel %vm1989_vm5, %v1939_v15, 0.0 }
 0x381   : > { %v2366_v19 = vpack.c.bf16 %v2005_v18, %v2004_v59  ;;  %v2003_v20 = vsel %vm1987_vm7, %v1937_v17, 0.0 }
 0x382   : > { %v2361_v21 = vpack.c.bf16 %v2003_v20, %v2002_v62 }
 0x383   : > { %2390 = vst [vmem:[%s3136_s5 + $0x18] sm:$0xff] %v2366_v19  }
 0x384   : > { %2389 = vst [vmem:[%s3136_s5 + $0x10] sm:$0xff] %v2361_v21  }
 0x389   : > { %v2789_v4 = vpop.f32.mrb[8].mxu0 }
 0x38a   : > { %v1926_v27 = vadd.f32 %v2789_v4, %v3462_v13  ;;  %v1862_v28 = vpop.f32.mrb[9].mxu0 }
 0x38b   : > { %v1924_v30 = vadd.f32 %v3462_v13, %v1862_v28  ;;  %v2790_v32 = vpop.f32.mrb[10].mxu0 }
 0x38c   : > { %v1942_v33 = vmax.f32 %v1926_v27, 0.0  ;;  %v1927_v16 = vadd.f32 %v2790_v32, %v3462_v13  ;;  %v1865_v34 = vpop.f32.mrb[11].mxu0 }
 0x38d   : > { %v1940_v36 = vmax.f32 %v1924_v30, 0.0  ;;  %v1925_v37 = vadd.f32 %v3462_v13, %v1865_v34 }
 0x38e   : > { %v1943_v39 = vmax.f32 %v1927_v16, 0.0  ;;  %v2008_v42 = vsel %vm1992_vm8, %v1942_v33, 0.0 }
 0x38f   : > { %v1941_v40 = vmax.f32 %v1925_v37, 0.0  ;;  %v2006_v43 = vsel %vm1990_vm10, %v1940_v36, 0.0 }
 0x390   : > { %v2009_v35 = vsel %vm1993_vm9, %v1943_v39, 0.0 }
 0x391   : > { %v2376_v38 = vpack.c.bf16 %v2009_v35, %v2008_v42  ;;  %v2007_v45 = vsel %vm1991_vm11, %v1941_v40, 0.0 }
 0x392   : > { %v2371_v46 = vpack.c.bf16 %v2007_v45, %v2006_v43 }
 0x393   : > { %2392 = vst [vmem:[%s3136_s5 + $0x28] sm:$0xff] %v2376_v38  }
 0x394   : > { %2391 = vst [vmem:[%s3136_s5 + $0x20] sm:$0xff] %v2371_v46  }
 0x399   : > { %v2793_v41 = vpop.f32.mrb[12].mxu0 }
 0x39a   : > { %v1930_v55 = vadd.f32 %v2793_v41, %v3462_v13  ;;  %v1878_v57 = vpop.f32.mrb[13].mxu0 }
 0x39b   : > { %v1928_v61 = vadd.f32 %v3462_v13, %v1878_v57  ;;  %v2794_v47 = vpop.f32.mrb[14].mxu0 }
 0x39c   : > { %v1946_v50 = vmax.f32 %v1930_v55, 0.0  ;;  %v1931_v63 = vadd.f32 %v2794_v47, %v3462_v13  ;;  %v1881_v7 = vpop.f32.mrb[15].mxu0 }
 0x39d   : > { %v1944_v0 = vmax.f32 %v1928_v61, 0.0  ;;  %v1929_v2 = vadd.f32 %v3462_v13, %v1881_v7 }
 0x39e   : > { %v1947_v3 = vmax.f32 %v1931_v63, 0.0  ;;  %v2012_v6 = vsel %vm1996_vm12, %v1946_v50, 0.0 }
 0x39f   : > { %v1945_v5 = vmax.f32 %v1929_v2, 0.0  ;;  %v2010_v8 = vsel %vm1994_vm14, %v1944_v0, 0.0 }
 0x3a0   : > { %v2013_v31 = vsel %vm1997_vm13, %v1947_v3, 0.0 }
 0x3a1   : > { %v2386_v53 = vpack.c.bf16 %v2013_v31, %v2012_v6  ;;  %v2011_v56 = vsel %vm1995_vm15, %v1945_v5, 0.0 }
 0x3a2   : > { %v2381_v9 = vpack.c.bf16 %v2011_v56, %v2010_v8 }
 0x3a3   : > { %2394 = vst [vmem:[%s3136_s5 + $0x38] sm:$0xff] %v2386_v53  }
 0x3a4   : > { %2393 = vst [vmem:[%s3136_s5 + $0x30] sm:$0xff] %v2381_v9  }
 0x3a5 PF: > { %s14_s19 = sadd.s32 1, %s3066_s19   ;;  %s3537_s15 = smov %s3058_s17 }
 0x3a6   : > { %p11_p8 = scmp.ge.s32.totalorder %s14_s19, 10   ;;  %s3538_s16 = smov %s3062_s18 }
 0x3a7   : > { %s3539_s17 = smov %s3542_s20  ;;  %s3540_s18 = smov %s3546_s21 }
 0x3a8   :  { %13 = sbr.rel (!%p11_p8) target bundleno = 3 (0x3), region = 77 }

// kernel: tagcn_forward.5
= control target key start
LH: loop header
LB: loop body
LE: loop exit
PB: predicated region body
PF: predicated region fallthrough
CT: control target
= control target key end

     0   :  { %s2935_s15 = smov 0   ;;  %s2937_s16 = smov 0   ;;  %s3381_s0 = inlined_call_operand.vmem [shape: bf16[512,512], index: 0, kind: input, shape index: {}]   ;;  %s3382_s1 = inlined_call_operand.vmem [shape: bf16[512,128], index: 1, kind: input, shape index: {}]   ;;  %s3383_s2 = inlined_call_operand.vmem [shape: bf16[384,128], index: 2, kind: input, shape index: {}]   ;;  %s3384_s3 = inlined_call_operand.vmem [shape: f32[1,128], index: 3, kind: input, shape index: {}]   ;;  %s3385_s4 = inlined_call_operand.vmem [shape: f32[512,128], index: 4, kind: output, shape index: {}]  }
   0x1   :  { %s2939_s17 = smov 0   ;;  %s2941_s18 = smov 0  }
   0x2   :  { %s2943_s19 = smov 0  }
   0x3 LB: > { %s23_s20 = sadd.s32 1, %s2899_s17  ;;  %s26_s21 = sadd.s32 1, %s2903_s18  ;;  %s2907_s19 = sphi %s2943_s19, %s14_s19   ;;  %s2903_s18 = sphi %s2941_s18, %s3389_s18   ;;  %s2899_s17 = sphi %s2939_s17, %s3388_s17   ;;  %s2895_s16 = sphi %s2937_s16, %s3387_s16   ;;  %s2891_s15 = sphi %s2935_s15, %s3386_s15  }
   0x4   : > { %p24_p0 = scmp.ge.s32.totalorder %s23_s20, 4  ;;  %p2092_p1 = scmp.ge.s32.totalorder %s2907_s19, 1 }
   0x5   : > { %p176_p2 = scmp.lt.s32.totalorder %s2907_s19, 9 }
   0x6   : > { %s3391_s20 = smov (%p24_p0, %s23_s20), 0  ;;  %s3393_s21 = smov (!%p24_p0, %s26_s21), %s2903_s18 }
   0x7   : > { %p177_p3 = pnand %p2092_p1, %p176_p2  ;;  %p28_p4 = scmp.ge.s32.totalorder %s3393_s21, 2 }
   0x8   : > { %s2093_s22 = sshll.u32 (!%p177_p3), %s2891_s15, 4  ;;  %s2967_s23 = sshll.u32 (!%p177_p3), %s2891_s15, 7 }
   0x9   : > { %s3395_s21 = smov (%p28_p4, %s3393_s21), 0  ;;  %180 = sbr.rel (%p177_p3) target bundleno = 929 (0x3a1), region = 36 }
   0xa   : > { %p204_p5 = scmp.lt.s32.totalorder (!%p177_p3), %s2093_s22, 63  ;;  %p2099_p6 = scmp.ne.s32.totalorder (!%p177_p3), %s2895_s16, 0 }
  0x10   : > { %s3397_s22 = smov (!%p204_p5, %s2093_s22), 63  ;;  %221 = sbr.rel (%p2099_p6) target bundleno = 330 (0x14a), region = 40 }
  0x11   : > { %s2235_s24 = sshll.u32 %s3397_s22, 4  ;;  %s2097_s25 = sshll.u32 %s3397_s22, 3  ;;  %v2709_v0 = vld [vmem:[%s3382_s1 + $0x40] sm:$0xff] (!%p2099_p6)   ;;  %v2909_v1 = vmov (!%p2099_p6), 0.0   ;;  %v2713_v5 = vld [vmem:[%s3382_s1 + $0x48] sm:$0xff] (!%p2099_p6)   ;;  %v2717_v9 = vld [vmem:[%s3382_s1 + $0x50] sm:$0xff] (!%p2099_p6)  }
  0x12   : > { %s2972_s28 = scalar_lea.vmem %s3381_s0, %s2235_s24  ;;  %s2977_s5 = scalar_lea.vmem %s3385_s4, %s2097_s25  ;;  %v2710_v2 = vld [vmem:[%s3382_s1 + $0xc0] sm:$0xff] (!%p2099_p6)   ;;  %2236 = vmatprep.subr.bf16.mxu0 (!%p2099_p6), %v2709_v0  ;;  %v2714_v6 = vld [vmem:[%s3382_s1 + $0xc8] sm:$0xff] (!%p2099_p6)   ;;  %v2718_v10 = vld [vmem:[%s3382_s1 + $0xd0] sm:$0xff] (!%p2099_p6)  }
  0x13   : > { %222 = vst [vmem:[%s2977_s5] sm:$0xff] (!%p2099_p6), %v2909_v1  ;;  %223 = vst [vmem:[%s2977_s5 + $0x8] sm:$0xff] (!%p2099_p6), %v2909_v1  ;;  %v2711_v3 = vld [vmem:[%s3382_s1] sm:$0xff] (!%p2099_p6)   ;;  %2300 = vmatprep.subr.bf16.mxu1 (!%p2099_p6), %v2710_v2  ;;  %v2715_v7 = vld [vmem:[%s3382_s1 + $0x8] sm:$0xff] (!%p2099_p6)   ;;  %s888_s26 = sshra.s32 (!%p2099_p6), %s2967_s23, 4 }
  0x14   : > { %224 = vst [vmem:[%s2977_s5 + $0x10] sm:$0xff] (!%p2099_p6), %v2909_v1  ;;  %225 = vst [vmem:[%s2977_s5 + $0x18] sm:$0xff] (!%p2099_p6), %v2909_v1  ;;  %v2712_v4 = vld [vmem:[%s3382_s1 + $0x80] sm:$0xff] (!%p2099_p6)   ;;  %2237 = vmatpush3.bf16.msra.mxu0 (!%p2099_p6), %v2711_v3  ;;  %v2716_v8 = vld [vmem:[%s3382_s1 + $0x88] sm:$0xff] (!%p2099_p6)   ;;  %s2164_s27 = sshll.u32 (!%p2099_p6), %s888_s26, 3 }
  0x15   : > { %226 = vst [vmem:[%s2977_s5 + $0x20] sm:$0xff] (!%p2099_p6), %v2909_v1  ;;  %227 = vst [vmem:[%s2977_s5 + $0x28] sm:$0xff] (!%p2099_p6), %v2909_v1  ;;  %2301 = vmatpush3.bf16.msra.mxu1 (!%p2099_p6), %v2712_v4  ;;  %2238 = vmatprep.subr.bf16.mxu0 (!%p2099_p6), %v2713_v5  ;;  %v2719_v11 = vld [vmem:[%s3382_s1 + $0x10] sm:$0xff] (!%p2099_p6)   ;;  %v2721_v13 = vld [vmem:[%s3382_s1 + $0x58] sm:$0xff] (!%p2099_p6)   ;;  %s3125_s29 = scalar_lea.vmem (!%p2099_p6), [#allocation2], %s2164_s27 }
  0x16   : > { %228 = vst [vmem:[%s2977_s5 + $0x30] sm:$0xff] (!%p2099_p6), %v2909_v1  ;;  %229 = vst [vmem:[%s2977_s5 + $0x38] sm:$0xff] (!%p2099_p6), %v2909_v1  ;;  %2302 = vmatprep.subr.bf16.mxu1 (!%p2099_p6), %v2714_v6  ;;  %v2720_v12 = vld [vmem:[%s3382_s1 + $0x90] sm:$0xff] (!%p2099_p6)   ;;  %v2722_v14 = vld [vmem:[%s3382_s1 + $0xd8] sm:$0xff] (!%p2099_p6)  }
  0x17   : > { %230 = vst [vmem:[%s2977_s5 + $0x40] sm:$0xff] %v2909_v1  ;;  %231 = vst [vmem:[%s2977_s5 + $0x48] sm:$0xff] %v2909_v1  ;;  %v2723_v15 = vld [vmem:[%s3382_s1 + $0x18] sm:$0xff]   ;;  %v2725_v17 = vld [vmem:[%s3382_s1 + $0x60] sm:$0xff]  }
  0x18   : > { %232 = vst [vmem:[%s2977_s5 + $0x50] sm:$0xff] %v2909_v1  ;;  %233 = vst [vmem:[%s2977_s5 + $0x58] sm:$0xff] %v2909_v1  ;;  %2239 = vmatpush3.bf16.msra.mxu0 %v2715_v7  ;;  %v2724_v16 = vld [vmem:[%s3382_s1 + $0x98] sm:$0xff]   ;;  %v2726_v18 = vld [vmem:[%s3382_s1 + $0xe0] sm:$0xff]  }
  0x19   : > { %234 = vst [vmem:[%s2977_s5 + $0x60] sm:$0xff] %v2909_v1  ;;  %235 = vst [vmem:[%s2977_s5 + $0x68] sm:$0xff] %v2909_v1  ;;  %2303 = vmatpush3.bf16.msra.mxu1 %v2716_v8  ;;  %2240 = vmatprep.subr.bf16.mxu0 %v2717_v9  ;;  %v2727_v19 = vld [vmem:[%s3382_s1 + $0x20] sm:$0xff]   ;;  %v2729_v21 = vld [vmem:[%s3382_s1 + $0x68] sm:$0xff]  }
  0x1a   : > { %236 = vst [vmem:[%s2977_s5 + $0x70] sm:$0xff] %v2909_v1  ;;  %237 = vst [vmem:[%s2977_s5 + $0x78] sm:$0xff] %v2909_v1  ;;  %2304 = vmatprep.subr.bf16.mxu1 %v2718_v10  ;;  %v2728_v20 = vld [vmem:[%s3382_s1 + $0xa0] sm:$0xff]   ;;  %v2730_v22 = vld [vmem:[%s3382_s1 + $0xe8] sm:$0xff]  }
  0x1b   : > { %v2731_v23 = vld [vmem:[%s3382_s1 + $0x28] sm:$0xff]   ;;  %v2733_v25 = vld [vmem:[%s3382_s1 + $0x70] sm:$0xff]   ;;  %v2737_v29 = vld [vmem:[%s3382_s1 + $0x78] sm:$0xff]  }
  0x1c   : > { %2241 = vmatpush3.bf16.msra.mxu0 %v2719_v11  ;;  %v2732_v24 = vld [vmem:[%s3382_s1 + $0xa8] sm:$0xff]   ;;  %v2734_v26 = vld [vmem:[%s3382_s1 + $0xf0] sm:$0xff]   ;;  %v2738_v30 = vld [vmem:[%s3382_s1 + $0xf8] sm:$0xff]  }
  0x1d   : > { %2305 = vmatpush3.bf16.msra.mxu1 %v2720_v12  ;;  %2242 = vmatprep.subr.bf16.mxu0 %v2721_v13  ;;  %v2735_v27 = vld [vmem:[%s3382_s1 + $0x30] sm:$0xff]   ;;  %v2739_v31 = vld [vmem:[%s3382_s1 + $0x38] sm:$0xff]  }
  0x1e   : > { %2306 = vmatprep.subr.bf16.mxu1 %v2722_v14  ;;  %v2736_v28 = vld [vmem:[%s3382_s1 + $0xb0] sm:$0xff]   ;;  %v2740_v32 = vld [vmem:[%s3382_s1 + $0xb8] sm:$0xff]  }
  0x1f   : > { %v2741_v33 = vld [vmem:[%s2972_s28] ss:$16 sps:$4 sm:$0xff]   ;;  %v2743_v34 = vld [vmem:[%s2972_s28 + $0x4] ss:$16 sps:$4 sm:$0xff]   ;;  %v2744_v35 = vld [vmem:[%s2972_s28 + $0x8] ss:$16 sps:$4 sm:$0xff]  }
  0x20   : > { %2243 = vmatpush3.bf16.msra.mxu0 %v2723_v15  ;;  %v2746_v36 = vld [vmem:[%s2972_s28 + $0xc] ss:$16 sps:$4 sm:$0xff]   ;;  %718 = vmatprep.mubr.bf16.mxu0 %v2743_v34  ;;  %v2747_v37 = vld [vmem:[%s2972_s28 + $0x24] ss:$16 sps:$4 sm:$0xff]   ;;  %v2751_v39 = vld [vmem:[%s2972_s28 + $0x20] ss:$16 sps:$4 sm:$0xff]  }
  0x21   : > { %2307 = vmatpush3.bf16.msra.mxu1 %v2724_v16  ;;  %2244 = vmatprep.subr.bf16.mxu0 %v2725_v17  ;;  %v2749_v38 = vld [vmem:[%s2972_s28 + $0x2c] ss:$16 sps:$4 sm:$0xff]   ;;  %v2752_v40 = vld [vmem:[%s2972_s28 + $0x28] ss:$16 sps:$4 sm:$0xff]   ;;  %v2753_v41 = vld [vmem:[%s2972_s28 + $0x44] ss:$16 sps:$4 sm:$0xff]  }
  0x22   : > { %2308 = vmatprep.subr.bf16.mxu1 %v2726_v18  ;;  %815 = vmatprep.mubr.bf16.mxu1 %v2746_v36  ;;  %v2755_v42 = vld [vmem:[%s2972_s28 + $0x4c] ss:$16 sps:$4 sm:$0xff]   ;;  %v2757_v43 = vld [vmem:[%s2972_s28 + $0x40] ss:$16 sps:$4 sm:$0xff]   ;;  %v2758_v44 = vld [vmem:[%s2972_s28 + $0x48] ss:$16 sps:$4 sm:$0xff]  }
  0x23   : > { %v2759_v45 = vld [vmem:[%s2972_s28 + $0x64] ss:$16 sps:$4 sm:$0xff]   ;;  %v2761_v46 = vld [vmem:[%s2972_s28 + $0x6c] ss:$16 sps:$4 sm:$0xff]   ;;  %v2763_v47 = vld [vmem:[%s2972_s28 + $0x60] ss:$16 sps:$4 sm:$0xff]  }
  0x24   : > { %2245 = vmatpush3.bf16.msra.mxu0 %v2727_v19  ;;  %v2764_v48 = vld [vmem:[%s2972_s28 + $0x68] ss:$16 sps:$4 sm:$0xff]   ;;  %v2765_v49 = vld [vmem:[%s2972_s28 + $0x84] ss:$16 sps:$4 sm:$0xff]   ;;  %v2767_v50 = vld [vmem:[%s2972_s28 + $0x8c] ss:$16 sps:$4 sm:$0xff]  }
  0x25   : > { %2309 = vmatpush3.bf16.msra.mxu1 %v2728_v20  ;;  %2246 = vmatprep.subr.bf16.mxu0 %v2729_v21  ;;  %v2769_v51 = vld [vmem:[%s2972_s28 + $0x80] ss:$16 sps:$4 sm:$0xff]   ;;  %v2770_v52 = vld [vmem:[%s2972_s28 + $0x88] ss:$16 sps:$4 sm:$0xff]   ;;  %v2771_v53 = vld [vmem:[%s2972_s28 + $0xa4] ss:$16 sps:$4 sm:$0xff]  }
  0x26   : > { %2310 = vmatprep.subr.bf16.mxu1 %v2730_v22  ;;  %v2773_v54 = vld [vmem:[%s2972_s28 + $0xac] ss:$16 sps:$4 sm:$0xff]   ;;  %v2775_v55 = vld [vmem:[%s2972_s28 + $0xa0] ss:$16 sps:$4 sm:$0xff]   ;;  %v2776_v56 = vld [vmem:[%s2972_s28 + $0xa8] ss:$16 sps:$4 sm:$0xff]  }
  0x27   : > { %v2777_v57 = vld [vmem:[%s2972_s28 + $0xc4] ss:$16 sps:$4 sm:$0xff]   ;;  %v2779_v58 = vld [vmem:[%s2972_s28 + $0xcc] ss:$16 sps:$4 sm:$0xff]   ;;  %v2781_v59 = vld [vmem:[%s2972_s28 + $0xc0] ss:$16 sps:$4 sm:$0xff]  }
  0x28   : > { %2247 = vmatpush3.bf16.msra.mxu0 %v2731_v23  ;;  %v2782_v60 = vld [vmem:[%s2972_s28 + $0xc8] ss:$16 sps:$4 sm:$0xff]   ;;  %v2783_v61 = vld [vmem:[%s2972_s28 + $0xe4] ss:$16 sps:$4 sm:$0xff]   ;;  %v2785_v62 = vld [vmem:[%s2972_s28 + $0xec] ss:$16 sps:$4 sm:$0xff]  }
  0x29   : > { %2311 = vmatpush3.bf16.msra.mxu1 %v2732_v24  ;;  %2248 = vmatprep.subr.bf16.mxu0 %v2733_v25  ;;  %v2787_v63 = vld [vmem:[%s2972_s28 + $0xe0] ss:$16 sps:$4 sm:$0xff]   ;;  %v2788_v0 = vld [vmem:[%s2972_s28 + $0xe8] ss:$16 sps:$4 sm:$0xff]  }
  0x2a   : > { %2312 = vmatprep.subr.bf16.mxu1 %v2734_v26 }
  0x2c   : > { %2249 = vmatpush3.bf16.msra.mxu0 %v2735_v27 }
  0x2d   : > { %2313 = vmatpush3.bf16.msra.mxu1 %v2736_v28  ;;  %2250 = vmatprep.subr.bf16.mxu0 %v2737_v29 }
  0x2e   : > { %2314 = vmatprep.subr.bf16.mxu1 %v2738_v30 }
  0x30   : > { %2251 = vmatpush3.bf16.msra.mxu0 %v2739_v31 }
  0x31   : > { %2315 = vmatpush3.bf16.msra.mxu1 %v2740_v32 }
  0x33   : > { %719 = vmatmul.mubr.bf16.vlgmr.msra.gmra.mrb[0].mxu0 %v2741_v33 }
  0x34   : > { %816 = vmatmul.mubr.bf16.vlgmr.msra.gmra.mrb[0].mxu1 %v2744_v35  ;;  %726 = vmatprep.mubr.bf16.mxu0 %v2747_v37 }
  0x35   : > { %823 = vmatprep.mubr.bf16.mxu1 %v2749_v38 }
  0x3b   : > { %727 = vmatmul.mubr.bf16.gmra.mrb[4].mxu0 %v2751_v39 }
  0x3c   : > { %824 = vmatmul.mubr.bf16.gmra.mrb[4].mxu1 %v2752_v40  ;;  %734 = vmatprep.mubr.bf16.mxu0 %v2753_v41 }
  0x3d   : > { %831 = vmatprep.mubr.bf16.mxu1 %v2755_v42 }
  0x43   : > { %735 = vmatmul.mubr.bf16.gmra.mrb[8].mxu0 %v2757_v43 }
  0x44   : > { %832 = vmatmul.mubr.bf16.gmra.mrb[8].mxu1 %v2758_v44  ;;  %742 = vmatprep.mubr.bf16.mxu0 %v2759_v45 }
  0x45   : > { %839 = vmatprep.mubr.bf16.mxu1 %v2761_v46 }
  0x4b   : > { %743 = vmatmul.mubr.bf16.gmra.mrb[12].mxu0 %v2763_v47 }
  0x4c   : > { %840 = vmatmul.mubr.bf16.gmra.mrb[12].mxu1 %v2764_v48  ;;  %750 = vmatprep.mubr.bf16.mxu0 %v2765_v49 }
  0x4d   : > { %847 = vmatprep.mubr.bf16.mxu1 %v2767_v50 }
  0x53   : > { %751 = vmatmul.mubr.bf16.gmra.mrb[16].mxu0 %v2769_v51 }
  0x54   : > { %848 = vmatmul.mubr.bf16.gmra.mrb[16].mxu1 %v2770_v52  ;;  %758 = vmatprep.mubr.bf16.mxu0 %v2771_v53 }
  0x55   : > { %855 = vmatprep.mubr.bf16.mxu1 %v2773_v54 }
  0x5b   : > { %759 = vmatmul.mubr.bf16.gmra.mrb[20].mxu0 %v2775_v55 }
  0x5c   : > { %856 = vmatmul.mubr.bf16.gmra.mrb[20].mxu1 %v2776_v56  ;;  %766 = vmatprep.mubr.bf16.mxu0 %v2777_v57 }
  0x5d   : > { %863 = vmatprep.mubr.bf16.mxu1 %v2779_v58 }
  0x63   : > { %767 = vmatmul.mubr.bf16.gmra.mrb[24].mxu0 %v2781_v59 }
  0x64   : > { %864 = vmatmul.mubr.bf16.gmra.mrb[24].mxu1 %v2782_v60  ;;  %774 = vmatprep.mubr.bf16.mxu0 %v2783_v61 }
  0x65   : > { %871 = vmatprep.mubr.bf16.mxu1 %v2785_v62 }
  0x6b   : > { %775 = vmatmul.mubr.bf16.gmra.mrb[28].mxu0 %v2787_v63 }
  0x6c   : > { %872 = vmatmul.mubr.bf16.gmra.mrb[28].mxu1 %v2788_v0 }
 0x106   : > { %v2252_v1 = vpop.f32.mrb[0].mxu0 }
 0x107   : > { %v2316_v2 = vpop.f32.mrb[0].mxu1  ;;  %v2253_v3 = vpop.f32.mrb[1].mxu0 }
 0x108   : > { %v2254_v4 = vadd.f32 %v2253_v3, %v2252_v1  ;;  %v2317_v5 = vpop.f32.mrb[1].mxu1  ;;  %v2255_v6 = vpop.f32.mrb[2].mxu0 }
 0x109   : > { %v2318_v7 = vadd.f32 %v2317_v5, %v2316_v2  ;;  %v2319_v8 = vpop.f32.mrb[2].mxu1  ;;  %v2256_v9 = vpop.f32.mrb[3].mxu0 }
 0x10a   : > { %v2257_v10 = vadd.f32 %v2256_v9, %v2255_v6  ;;  %v2320_v11 = vpop.f32.mrb[3].mxu1 }
 0x10b   : > { %v818_v12 = vadd.f32 %v2318_v7, %v2254_v4  ;;  %v2321_v13 = vadd.f32 %v2320_v11, %v2319_v8 }
 0x10d   : > { %v821_v14 = vadd.f32 %v2321_v13, %v2257_v10 }
 0x10e   : > { %v2258_v15 = vpop.f32.mrb[4].mxu0 }
 0x10f   : > { %v880_v16 = vpack.c.bf16 %v821_v14, %v818_v12  ;;  %v2322_v17 = vpop.f32.mrb[4].mxu1  ;;  %v2259_v18 = vpop.f32.mrb[5].mxu0 }
 0x110   : > { %v2260_v19 = vadd.f32 %v2259_v18, %v2258_v15  ;;  %v2323_v20 = vpop.f32.mrb[5].mxu1  ;;  %v2261_v21 = vpop.f32.mrb[6].mxu0 }
 0x111   : > { %892 = vst [vmem:[%s3125_s29] sm:$0xff] %v880_v16  ;;  %v2324_v22 = vadd.f32 %v2323_v20, %v2322_v17  ;;  %v2325_v23 = vpop.f32.mrb[6].mxu1  ;;  %v2262_v24 = vpop.f32.mrb[7].mxu0 }
 0x112   : > { %v2263_v25 = vadd.f32 %v2262_v24, %v2261_v21  ;;  %v2326_v26 = vpop.f32.mrb[7].mxu1 }
 0x113   : > { %v826_v27 = vadd.f32 %v2324_v22, %v2260_v19  ;;  %v2327_v28 = vadd.f32 %v2326_v26, %v2325_v23 }
 0x115   : > { %v829_v29 = vadd.f32 %v2327_v28, %v2263_v25 }
 0x116   : > { %v2264_v30 = vpop.f32.mrb[8].mxu0 }
 0x117   : > { %v881_v31 = vpack.c.bf16 %v829_v29, %v826_v27  ;;  %v2328_v32 = vpop.f32.mrb[8].mxu1  ;;  %v2265_v33 = vpop.f32.mrb[9].mxu0 }
 0x118   : > { %v2266_v34 = vadd.f32 %v2265_v33, %v2264_v30  ;;  %v2329_v35 = vpop.f32.mrb[9].mxu1  ;;  %v2267_v36 = vpop.f32.mrb[10].mxu0 }
 0x119   : > { %893 = vst [vmem:[%s3125_s29 + $0x8] sm:$0xff] %v881_v31  ;;  %v2330_v37 = vadd.f32 %v2329_v35, %v2328_v32  ;;  %v2331_v38 = vpop.f32.mrb[10].mxu1  ;;  %v2268_v39 = vpop.f32.mrb[11].mxu0 }
 0x11a   : > { %v2269_v40 = vadd.f32 %v2268_v39, %v2267_v36  ;;  %v2332_v41 = vpop.f32.mrb[11].mxu1 }
 0x11b   : > { %v834_v42 = vadd.f32 %v2330_v37, %v2266_v34  ;;  %v2333_v43 = vadd.f32 %v2332_v41, %v2331_v38 }
 0x11d   : > { %v837_v44 = vadd.f32 %v2333_v43, %v2269_v40 }
 0x11e   : > { %v2270_v45 = vpop.f32.mrb[12].mxu0 }
 0x11f   : > { %v882_v46 = vpack.c.bf16 %v837_v44, %v834_v42  ;;  %v2334_v47 = vpop.f32.mrb[12].mxu1  ;;  %v2271_v48 = vpop.f32.mrb[13].mxu0 }
 0x120   : > { %v2272_v49 = vadd.f32 %v2271_v48, %v2270_v45  ;;  %v2335_v50 = vpop.f32.mrb[13].mxu1  ;;  %v2273_v51 = vpop.f32.mrb[14].mxu0 }
 0x121   : > { %894 = vst [vmem:[%s3125_s29 + $0x10] sm:$0xff] %v882_v46  ;;  %v2336_v52 = vadd.f32 %v2335_v50, %v2334_v47  ;;  %v2337_v53 = vpop.f32.mrb[14].mxu1  ;;  %v2274_v54 = vpop.f32.mrb[15].mxu0 }
 0x122   : > { %v2275_v55 = vadd.f32 %v2274_v54, %v2273_v51  ;;  %v2338_v56 = vpop.f32.mrb[15].mxu1 }
 0x123   : > { %v842_v57 = vadd.f32 %v2336_v52, %v2272_v49  ;;  %v2339_v58 = vadd.f32 %v2338_v56, %v2337_v53 }
 0x125   : > { %v845_v59 = vadd.f32 %v2339_v58, %v2275_v55 }
 0x126   : > { %v2276_v60 = vpop.f32.mrb[16].mxu0 }
 0x127   : > { %v883_v61 = vpack.c.bf16 %v845_v59, %v842_v57  ;;  %v2340_v62 = vpop.f32.mrb[16].mxu1  ;;  %v2277_v63 = vpop.f32.mrb[17].mxu0 }
 0x128   : > { %v2278_v0 = vadd.f32 %v2277_v63, %v2276_v60  ;;  %v2341_v1 = vpop.f32.mrb[17].mxu1  ;;  %v2279_v2 = vpop.f32.mrb[18].mxu0 }
 0x129   : > { %895 = vst [vmem:[%s3125_s29 + $0x18] sm:$0xff] %v883_v61  ;;  %v2342_v3 = vadd.f32 %v2341_v1, %v2340_v62  ;;  %v2343_v4 = vpop.f32.mrb[18].mxu1  ;;  %v2280_v5 = vpop.f32.mrb[19].mxu0 }
 0x12a   : > { %v2281_v6 = vadd.f32 %v2280_v5, %v2279_v2  ;;  %v2344_v7 = vpop.f32.mrb[19].mxu1 }
 0x12b   : > { %v850_v8 = vadd.f32 %v2342_v3, %v2278_v0  ;;  %v2345_v9 = vadd.f32 %v2344_v7, %v2343_v4 }
 0x12d   : > { %v853_v10 = vadd.f32 %v2345_v9, %v2281_v6 }
 0x12e   : > { %v2282_v11 = vpop.f32.mrb[20].mxu0 }
 0x12f   : > { %v884_v12 = vpack.c.bf16 %v853_v10, %v850_v8  ;;  %v2346_v13 = vpop.f32.mrb[20].mxu1  ;;  %v2283_v14 = vpop.f32.mrb[21].mxu0 }
 0x130   : > { %v2284_v15 = vadd.f32 %v2283_v14, %v2282_v11  ;;  %v2347_v16 = vpop.f32.mrb[21].mxu1  ;;  %v2285_v17 = vpop.f32.mrb[22].mxu0 }
 0x131   : > { %896 = vst [vmem:[%s3125_s29 + $0x20] sm:$0xff] %v884_v12  ;;  %v2348_v18 = vadd.f32 %v2347_v16, %v2346_v13  ;;  %v2349_v19 = vpop.f32.mrb[22].mxu1  ;;  %v2286_v20 = vpop.f32.mrb[23].mxu0 }
 0x132   : > { %v2287_v21 = vadd.f32 %v2286_v20, %v2285_v17  ;;  %v2350_v22 = vpop.f32.mrb[23].mxu1 }
 0x133   : > { %v858_v23 = vadd.f32 %v2348_v18, %v2284_v15  ;;  %v2351_v24 = vadd.f32 %v2350_v22, %v2349_v19 }
 0x135   : > { %v861_v25 = vadd.f32 %v2351_v24, %v2287_v21 }
 0x136   : > { %v2288_v26 = vpop.f32.mrb[24].mxu0 }
 0x137   : > { %v885_v27 = vpack.c.bf16 %v861_v25, %v858_v23  ;;  %v2352_v28 = vpop.f32.mrb[24].mxu1  ;;  %v2289_v29 = vpop.f32.mrb[25].mxu0 }
 0x138   : > { %v2290_v30 = vadd.f32 %v2289_v29, %v2288_v26  ;;  %v2353_v31 = vpop.f32.mrb[25].mxu1  ;;  %v2291_v32 = vpop.f32.mrb[26].mxu0 }
 0x139   : > { %897 = vst [vmem:[%s3125_s29 + $0x28] sm:$0xff] %v885_v27  ;;  %v2354_v33 = vadd.f32 %v2353_v31, %v2352_v28  ;;  %v2355_v34 = vpop.f32.mrb[26].mxu1  ;;  %v2292_v35 = vpop.f32.mrb[27].mxu0 }
 0x13a   : > { %v2293_v36 = vadd.f32 %v2292_v35, %v2291_v32  ;;  %v2356_v37 = vpop.f32.mrb[27].mxu1 }
 0x13b   : > { %v866_v38 = vadd.f32 %v2354_v33, %v2290_v30  ;;  %v2357_v39 = vadd.f32 %v2356_v37, %v2355_v34 }
 0x13d   : > { %v869_v40 = vadd.f32 %v2357_v39, %v2293_v36 }
 0x13e   : > { %v2294_v41 = vpop.f32.mrb[28].mxu0 }
 0x13f   : > { %v886_v42 = vpack.c.bf16 %v869_v40, %v866_v38  ;;  %v2358_v43 = vpop.f32.mrb[28].mxu1  ;;  %v2295_v44 = vpop.f32.mrb[29].mxu0 }
 0x140   : > { %v2296_v45 = vadd.f32 %v2295_v44, %v2294_v41  ;;  %v2359_v46 = vpop.f32.mrb[29].mxu1  ;;  %v2297_v47 = vpop.f32.mrb[30].mxu0 }
 0x141   : > { %898 = vst [vmem:[%s3125_s29 + $0x30] sm:$0xff] %v886_v42  ;;  %v2360_v48 = vadd.f32 %v2359_v46, %v2358_v43  ;;  %v2361_v49 = vpop.f32.mrb[30].mxu1  ;;  %v2298_v50 = vpop.f32.mrb[31].mxu0 }
 0x142   : > { %v2299_v51 = vadd.f32 %v2298_v50, %v2297_v47  ;;  %v2362_v52 = vpop.f32.mrb[31].mxu1 }
 0x143   : > { %v874_v53 = vadd.f32 %v2360_v48, %v2296_v45  ;;  %v2363_v54 = vadd.f32 %v2362_v52, %v2361_v49 }
 0x145   : > { %v877_v55 = vadd.f32 %v2363_v54, %v2299_v51 }
 0x147   : > { %v887_v56 = vpack.c.bf16 %v877_v55, %v874_v53 }
 0x149   : > { %899 = vst [vmem:[%s3125_s29 + $0x38] sm:$0xff] %v887_v56 }
 0x14a PF: > { %p2165_p7 = scmp.ne.s32.totalorder %s2895_s16, 1 }
 0x14b   : > { %v2791_v62 = vld [vmem:[%s2972_s28 + $0x4] ss:$16 sps:$4 sm:$0xff] (!%p2165_p7)   ;;  %v2789_v11 = vld [vmem:[%s2972_s28] ss:$16 sps:$4 sm:$0xff] (!%p2165_p7)   ;;  %v2838_v17 = vld [vmem:[%s3383_s2 + $0x48] sm:$0xff] (!%p2165_p7)   ;;  %s924_s27 = sshra.s32 (!%p2165_p7), %s2967_s23, 4 }
 0x14c   : > { %903 = sbr.rel (%p2165_p7) target bundleno = 929 (0x3a1), region = 44  ;;  %1192 = vmatprep.mubr.bf16.mxu1 (!%p2165_p7), %v2791_v62  ;;  %v2792_v12 = vld [vmem:[%s2972_s28 + $0x24] ss:$16 sps:$4 sm:$0xff] (!%p2165_p7)   ;;  %v2794_v19 = vld [vmem:[%s2972_s28 + $0x20] ss:$16 sps:$4 sm:$0xff] (!%p2165_p7)   ;;  %v2840_v24 = vld [vmem:[%s3383_s2 + $0x58] sm:$0xff] (!%p2165_p7)  }
 0x14d   : > { %v2837_v15 = vld [vmem:[%s3383_s2 + $0x40] sm:$0xff] (!%p2165_p7)   ;;  %v2839_v20 = vld [vmem:[%s3383_s2 + $0x50] sm:$0xff] (!%p2165_p7)   ;;  %v2815_v45 = vld [vmem:[%s2972_s28 + $0xc] ss:$16 sps:$4 sm:$0xff] (!%p2165_p7)   ;;  %s2167_s29 = sshll.u32 (!%p2165_p7), %s924_s27, 3  ;;  %s904_s27 = sshra.s32 (!%p2165_p7), %s2967_s23, 3 }
 0x14e   : > { %2540 = vmatprep.subr.bf16.mxu0 (!%p2165_p7), %v2837_v15  ;;  %v2795_v21 = vld [vmem:[%s2972_s28 + $0x44] ss:$16 sps:$4 sm:$0xff] (!%p2165_p7)   ;;  %v2797_v27 = vld [vmem:[%s2972_s28 + $0x40] ss:$16 sps:$4 sm:$0xff] (!%p2165_p7)   ;;  %v2813_v46 = vld [vmem:[%s2972_s28 + $0x8] ss:$16 sps:$4 sm:$0xff] (!%p2165_p7)  }
 0x14f   : > { %2541 = vmatpush3.bf16.msra.mxu0 (!%p2165_p7), %v2837_v15  ;;  %v2798_v28 = vld [vmem:[%s2972_s28 + $0x64] ss:$16 sps:$4 sm:$0xff] (!%p2165_p7)   ;;  %v2800_v33 = vld [vmem:[%s2972_s28 + $0x60] ss:$16 sps:$4 sm:$0xff] (!%p2165_p7)   ;;  %v2816_v47 = vld [vmem:[%s2972_s28 + $0x2c] ss:$16 sps:$4 sm:$0xff] (!%p2165_p7)  }
 0x150   : > { %v976_v57 = vld [vmem:[#allocation2 + $0x40] sm:$0xff] (!%p2165_p7)  ;;  %v977_v59 = vld [vmem:[#allocation2 + $0x48] sm:$0xff] (!%p2165_p7)  ;;  %v978_v61 = vld [vmem:[#allocation2 + $0x50] sm:$0xff] (!%p2165_p7)  ;;  %2542 = vmatprep.subr.bf16.mxu0 (!%p2165_p7), %v2838_v17  ;;  %s3188_s16 = scalar_lea.vmem (!%p2165_p7), [#allocation2], %s2167_s29  ;;  %s2166_s29 = sshll.u32 (!%p2165_p7), %s904_s27, 2 }
 0x151   : > { %v968_v58 = vld [vmem:[#allocation2] sm:$0xff] (!%p2165_p7)  ;;  %2364 = vmatprep.subr.bf16.mxu1 (!%p2165_p7), %v976_v57  ;;  %v969_v60 = vld [vmem:[#allocation2 + $0x8] sm:$0xff] (!%p2165_p7)  ;;  %v970_v63 = vld [vmem:[#allocation2 + $0x10] sm:$0xff] (!%p2165_p7)  ;;  %s3231_s7 = scalar_lea.vmem (!%p2165_p7), %s3382_s1, %s2166_s29 }
 0x152   : > { %2365 = vmatpush3.bf16.msra.mxu1 (!%p2165_p7), %v968_v58  ;;  %v979_v0 = vld [vmem:[#allocation2 + $0x58] sm:$0xff] (!%p2165_p7)  ;;  %v980_v2 = vld [vmem:[#allocation2 + $0x60] sm:$0xff] (!%p2165_p7)  ;;  %v981_v4 = vld [vmem:[#allocation2 + $0x68] sm:$0xff] (!%p2165_p7) }
 0x153   : > { %2366 = vmatprep.subr.bf16.mxu1 %v977_v59  ;;  %v971_v1 = vld [vmem:[#allocation2 + $0x18] sm:$0xff]  ;;  %v972_v3 = vld [vmem:[#allocation2 + $0x20] sm:$0xff]  ;;  %v973_v5 = vld [vmem:[#allocation2 + $0x28] sm:$0xff]  ;;  %2543 = vmatpush3.bf16.msra.mxu0 %v2838_v17 }
 0x154   : > { %v982_v6 = vld [vmem:[#allocation2 + $0x70] sm:$0xff]  ;;  %v983_v8 = vld [vmem:[#allocation2 + $0x78] sm:$0xff]  ;;  %v992_v10 = vld [vmem:[#allocation2 + $0xc0] sm:$0xff]  ;;  %2544 = vmatprep.subr.bf16.mxu0 %v2839_v20 }
 0x155   : > { %v974_v7 = vld [vmem:[#allocation2 + $0x30] sm:$0xff]  ;;  %v975_v9 = vld [vmem:[#allocation2 + $0x38] sm:$0xff]  ;;  %v984_v13 = vld [vmem:[#allocation2 + $0x80] sm:$0xff] }
 0x156   : > { %2367 = vmatpush3.bf16.msra.mxu1 %v969_v60  ;;  %v993_v14 = vld [vmem:[#allocation2 + $0xc8] sm:$0xff]  ;;  %v994_v18 = vld [vmem:[#allocation2 + $0xd0] sm:$0xff]  ;;  %v995_v23 = vld [vmem:[#allocation2 + $0xd8] sm:$0xff] }
 0x157   : > { %2368 = vmatprep.subr.bf16.mxu1 %v978_v61  ;;  %v985_v16 = vld [vmem:[#allocation2 + $0x88] sm:$0xff]  ;;  %v986_v22 = vld [vmem:[#allocation2 + $0x90] sm:$0xff]  ;;  %v987_v25 = vld [vmem:[#allocation2 + $0x98] sm:$0xff]  ;;  %2545 = vmatpush3.bf16.msra.mxu0 %v2839_v20 }
 0x158   : > { %v996_v26 = vld [vmem:[#allocation2 + $0xe0] sm:$0xff]  ;;  %2546 = vmatprep.subr.bf16.mxu0 %v2840_v24  ;;  %v997_v30 = vld [vmem:[#allocation2 + $0xe8] sm:$0xff]  ;;  %v998_v32 = vld [vmem:[#allocation2 + $0xf0] sm:$0xff] }
 0x159   : > { %v988_v29 = vld [vmem:[#allocation2 + $0xa0] sm:$0xff]  ;;  %v989_v31 = vld [vmem:[#allocation2 + $0xa8] sm:$0xff]  ;;  %v990_v35 = vld [vmem:[#allocation2 + $0xb0] sm:$0xff] }
 0x15a   : > { %2369 = vmatpush3.bf16.msra.mxu1 %v970_v63  ;;  %v2801_v34 = vld [vmem:[%s2972_s28 + $0x84] ss:$16 sps:$4 sm:$0xff]   ;;  %v999_v36 = vld [vmem:[#allocation2 + $0xf8] sm:$0xff]  ;;  %v2803_v38 = vld [vmem:[%s2972_s28 + $0x80] ss:$16 sps:$4 sm:$0xff]  }
 0x15b   : > { %2370 = vmatprep.subr.bf16.mxu1 %v979_v0  ;;  %2547 = vmatpush3.bf16.msra.mxu0 %v2840_v24  ;;  %v991_v37 = vld [vmem:[#allocation2 + $0xb8] sm:$0xff]  ;;  %v2804_v39 = vld [vmem:[%s2972_s28 + $0xa4] ss:$16 sps:$4 sm:$0xff]   ;;  %v2806_v40 = vld [vmem:[%s2972_s28 + $0xa0] ss:$16 sps:$4 sm:$0xff]  }
 0x15c   : > { %v2807_v41 = vld [vmem:[%s2972_s28 + $0xc4] ss:$16 sps:$4 sm:$0xff]   ;;  %v2809_v42 = vld [vmem:[%s2972_s28 + $0xc0] ss:$16 sps:$4 sm:$0xff]   ;;  %v2818_v48 = vld [vmem:[%s2972_s28 + $0x28] ss:$16 sps:$4 sm:$0xff]  }
 0x15d   : > { %v2810_v43 = vld [vmem:[%s2972_s28 + $0xe4] ss:$16 sps:$4 sm:$0xff]   ;;  %v2812_v44 = vld [vmem:[%s2972_s28 + $0xe0] ss:$16 sps:$4 sm:$0xff]   ;;  %v2819_v49 = vld [vmem:[%s2972_s28 + $0x4c] ss:$16 sps:$4 sm:$0xff]  }
 0x15e   : > { %2371 = vmatpush3.bf16.msra.mxu1 %v971_v1  ;;  %v2821_v50 = vld [vmem:[%s2972_s28 + $0x48] ss:$16 sps:$4 sm:$0xff]   ;;  %v2822_v51 = vld [vmem:[%s2972_s28 + $0x6c] ss:$16 sps:$4 sm:$0xff]   ;;  %v2841_v52 = vld [vmem:[%s3383_s2 + $0x60] sm:$0xff]  }
 0x15f   : > { %2372 = vmatprep.subr.bf16.mxu1 %v980_v2  ;;  %v2824_v53 = vld [vmem:[%s2972_s28 + $0x68] ss:$16 sps:$4 sm:$0xff]   ;;  %2548 = vmatprep.subr.bf16.mxu0 %v2841_v52  ;;  %v2825_v54 = vld [vmem:[%s2972_s28 + $0x8c] ss:$16 sps:$4 sm:$0xff]   ;;  %v2843_v56 = vld [vmem:[%s3383_s2 + $0x70] sm:$0xff]  }
 0x160   : > { %2549 = vmatpush3.bf16.msra.mxu0 %v2841_v52  ;;  %v2842_v55 = vld [vmem:[%s3383_s2 + $0x68] sm:$0xff]   ;;  %v2844_v59 = vld [vmem:[%s3383_s2 + $0x78] sm:$0xff]   ;;  %v928_v60 = vld [vmem:[%s3188_s16] sm:$0xff] }
 0x161   : > { %2550 = vmatprep.subr.bf16.mxu0 %v2842_v55  ;;  %v2827_v57 = vld [vmem:[%s2972_s28 + $0x88] ss:$16 sps:$4 sm:$0xff]   ;;  %v2828_v58 = vld [vmem:[%s2972_s28 + $0xac] ss:$16 sps:$4 sm:$0xff]   ;;  %v2845_v61 = vld [vmem:[%s3383_s2] sm:$0xff]   ;;  %2556 = vmatprep.mubr.bf16.mxu0 %v928_v60 }
 0x162   : > { %2373 = vmatpush3.bf16.msra.mxu1 %v972_v3  ;;  %v929_v62 = vld [vmem:[%s3188_s16 + $0x8] sm:$0xff]  ;;  %v930_v2 = vld [vmem:[%s3188_s16 + $0x10] sm:$0xff]  ;;  %v935_v15 = vld [vmem:[%s3188_s16 + $0x38] sm:$0xff] }
 0x163   : > { %2374 = vmatprep.subr.bf16.mxu1 %v981_v4  ;;  %v2830_v63 = vld [vmem:[%s2972_s28 + $0xa8] ss:$16 sps:$4 sm:$0xff]   ;;  %v2831_v0 = vld [vmem:[%s2972_s28 + $0xcc] ss:$16 sps:$4 sm:$0xff]   ;;  %v2847_v3 = vld [vmem:[%s3383_s2 + $0x10] sm:$0xff]  }
 0x164   : > { %2551 = vmatpush3.bf16.msra.mxu0 %v2842_v55  ;;  %v2846_v1 = vld [vmem:[%s3383_s2 + $0x8] sm:$0xff]   ;;  %v931_v4 = vld [vmem:[%s3188_s16 + $0x18] sm:$0xff]  ;;  %v2853_v17 = vld [vmem:[%s3231_s7] sm:$0xff]  }
 0x165   : > { %2552 = vmatprep.subr.bf16.mxu0 %v2843_v56  ;;  %v2856_v20 = vld [vmem:[%s3383_s2 + $0x88] sm:$0xff]   ;;  %v2860_v24 = vld [vmem:[%s3383_s2 + $0x98] sm:$0xff]  }
 0x166   : > { %2375 = vmatpush3.bf16.msra.mxu1 %v973_v5  ;;  %v2833_v5 = vld [vmem:[%s2972_s28 + $0xc8] ss:$16 sps:$4 sm:$0xff]  }
 0x167   : > { %2376 = vmatprep.subr.bf16.mxu1 %v982_v6  ;;  %v2834_v6 = vld [vmem:[%s2972_s28 + $0xec] ss:$16 sps:$4 sm:$0xff]  }
 0x168   : > { %2553 = vmatpush3.bf16.msra.mxu0 %v2843_v56 }
 0x169   : > { %2554 = vmatprep.subr.bf16.mxu0 %v2844_v59 }
 0x16a   : > { %2377 = vmatpush3.bf16.msra.mxu1 %v974_v7  ;;  %v2848_v7 = vld [vmem:[%s3383_s2 + $0x18] sm:$0xff]  }
 0x16b   : > { %2378 = vmatprep.subr.bf16.mxu1 %v983_v8  ;;  %v932_v8 = vld [vmem:[%s3188_s16 + $0x20] sm:$0xff] }
 0x16c   : > { %2555 = vmatpush3.bf16.msra.mxu0 %v2844_v59 }
 0x16d   : > { %2572 = vmatprep.subr.bf16.mxu0 %v2845_v61 }
 0x16e   : > { %2379 = vmatpush3.bf16.msra.mxu1 %v975_v9  ;;  %v2849_v9 = vld [vmem:[%s3383_s2 + $0x20] sm:$0xff]  }
 0x16f   : > { %2428 = vmatprep.subr.bf16.mxu1 %v992_v10  ;;  %2557 = vmatmul.mubr.bf16.vlgmr.msra.gmra.mrb[0].mxu0 %v929_v62  ;;  %v933_v10 = vld [vmem:[%s3188_s16 + $0x28] sm:$0xff] }
 0x170   : > { %2573 = vmatpush3.bf16.msra.mxu0 %v2845_v61  ;;  %2560 = vmatprep.mubr.bf16.mxu0 %v930_v2 }
 0x171   : > { %1193 = vmatmul.mubr.bf16.vlgmr.msra.gmra.mrb[0].mxu1 %v2789_v11  ;;  %2574 = vmatprep.subr.bf16.mxu0 %v2846_v1  ;;  %v2836_v11 = vld [vmem:[%s2972_s28 + $0xe8] ss:$16 sps:$4 sm:$0xff]  }
 0x172   : > { %2429 = vmatpush3.bf16.msra.mxu1 %v984_v13  ;;  %1200 = vmatprep.mubr.bf16.mxu1 %v2792_v12  ;;  %v2850_v12 = vld [vmem:[%s3383_s2 + $0x28] sm:$0xff]   ;;  %v934_v13 = vld [vmem:[%s3188_s16 + $0x30] sm:$0xff] }
 0x173   : > { %2430 = vmatprep.subr.bf16.mxu1 %v993_v14  ;;  %v2851_v14 = vld [vmem:[%s3383_s2 + $0x30] sm:$0xff]  }
 0x174   : > { %2575 = vmatpush3.bf16.msra.mxu0 %v2846_v1 }
 0x175   : > { %2576 = vmatprep.subr.bf16.mxu0 %v2847_v3 }
 0x176   : > { %2431 = vmatpush3.bf16.msra.mxu1 %v985_v16  ;;  %v2852_v16 = vld [vmem:[%s3383_s2 + $0x38] sm:$0xff]  }
 0x177   : > { %2432 = vmatprep.subr.bf16.mxu1 %v994_v18  ;;  %2561 = vmatmul.mubr.bf16.gmra.mrb[4].mxu0 %v931_v4  ;;  %v2854_v18 = vld [vmem:[%s3231_s7 + $0x8] sm:$0xff]  }
 0x178   : > { %2577 = vmatpush3.bf16.msra.mxu0 %v2847_v3  ;;  %2564 = vmatprep.mubr.bf16.mxu0 %v932_v8 }
 0x179   : > { %1201 = vmatmul.mubr.bf16.gmra.mrb[4].mxu1 %v2794_v19  ;;  %2578 = vmatprep.subr.bf16.mxu0 %v2848_v7  ;;  %v2855_v19 = vld [vmem:[%s3383_s2 + $0x80] sm:$0xff]  }
 0x17a   : > { %1208 = vmatprep.mubr.bf16.mxu1 %v2795_v21  ;;  %2433 = vmatpush3.bf16.msra.mxu1 %v986_v22  ;;  %v2857_v21 = vld [vmem:[%s3231_s7 + $0x10] sm:$0xff]   ;;  %v2858_v22 = vld [vmem:[%s3231_s7 + $0x18] sm:$0xff]  }
 0x17b   : > { %2434 = vmatprep.subr.bf16.mxu1 %v995_v23  ;;  %v2859_v23 = vld [vmem:[%s3383_s2 + $0x90] sm:$0xff]  }
 0x17c   : > { %2579 = vmatpush3.bf16.msra.mxu0 %v2848_v7 }
 0x17d   : > { %2580 = vmatprep.subr.bf16.mxu0 %v2849_v9 }
 0x17e   : > { %2435 = vmatpush3.bf16.msra.mxu1 %v987_v25  ;;  %v2861_v25 = vld [vmem:[%s3231_s7 + $0x20] sm:$0xff]  }
 0x17f   : > { %2436 = vmatprep.subr.bf16.mxu1 %v996_v26  ;;  %2565 = vmatmul.mubr.bf16.gmra.mrb[8].mxu0 %v933_v10  ;;  %v2862_v26 = vld [vmem:[%s3231_s7 + $0x28] sm:$0xff]  }
 0x180   : > { %2581 = vmatpush3.bf16.msra.mxu0 %v2849_v9  ;;  %2568 = vmatprep.mubr.bf16.mxu0 %v934_v13 }
 0x181   : > { %1209 = vmatmul.mubr.bf16.gmra.mrb[8].mxu1 %v2797_v27  ;;  %2582 = vmatprep.subr.bf16.mxu0 %v2850_v12  ;;  %v2863_v27 = vld [vmem:[%s3383_s2 + $0xa0] sm:$0xff]  }
 0x182   : > { %1216 = vmatprep.mubr.bf16.mxu1 %v2798_v28  ;;  %2437 = vmatpush3.bf16.msra.mxu1 %v988_v29  ;;  %v2864_v28 = vld [vmem:[%s3383_s2 + $0xa8] sm:$0xff]   ;;  %v2865_v29 = vld [vmem:[%s3231_s7 + $0x30] sm:$0xff]  }
 0x183   : > { %2438 = vmatprep.subr.bf16.mxu1 %v997_v30  ;;  %v2866_v30 = vld [vmem:[%s3231_s7 + $0x38] sm:$0xff]  }
 0x184   : > { %2583 = vmatpush3.bf16.msra.mxu0 %v2850_v12 }
 0x185   : > { %2584 = vmatprep.subr.bf16.mxu0 %v2851_v14 }
 0x186   : > { %2439 = vmatpush3.bf16.msra.mxu1 %v989_v31  ;;  %v2867_v31 = vld [vmem:[%s3383_s2 + $0xb0] sm:$0xff]  }
 0x187   : > { %2440 = vmatprep.subr.bf16.mxu1 %v998_v32  ;;  %2569 = vmatmul.mubr.bf16.gmra.mrb[12].mxu0 %v935_v15  ;;  %v2868_v32 = vld [vmem:[%s3383_s2 + $0xb8] sm:$0xff]  }
 0x188   : > { %2585 = vmatpush3.bf16.msra.mxu0 %v2851_v14  ;;  %2588 = vmatprep.mubr.bf16.mxu0 %v2853_v17 }
 0x189   : > { %1217 = vmatmul.mubr.bf16.gmra.mrb[12].mxu1 %v2800_v33  ;;  %2586 = vmatprep.subr.bf16.mxu0 %v2852_v16 }
 0x18a   : > { %1224 = vmatprep.mubr.bf16.mxu1 %v2801_v34  ;;  %2441 = vmatpush3.bf16.msra.mxu1 %v990_v35 }
 0x18b   : > { %2442 = vmatprep.subr.bf16.mxu1 %v999_v36 }
 0x18c   : > { %2587 = vmatpush3.bf16.msra.mxu0 %v2852_v16 }
 0x18d   : > { %2604 = vmatprep.subr.bf16.mxu0 %v2855_v19 }
 0x18e   : > { %2443 = vmatpush3.bf16.msra.mxu1 %v991_v37 }
 0x18f   : > { %2589 = vmatmul.mubr.bf16.vlgmr.msra.gmra.mrb[0].mxu0 %v2854_v18 }
 0x190   : > { %2605 = vmatpush3.bf16.msra.mxu0 %v2855_v19  ;;  %2592 = vmatprep.mubr.bf16.mxu0 %v2857_v21 }
 0x191   : > { %1225 = vmatmul.mubr.bf16.gmra.mrb[16].mxu1 %v2803_v38  ;;  %2606 = vmatprep.subr.bf16.mxu0 %v2856_v20 }
 0x192   : > { %1232 = vmatprep.mubr.bf16.mxu1 %v2804_v39 }
 0x194   : > { %2607 = vmatpush3.bf16.msra.mxu0 %v2856_v20 }
 0x195   : > { %2608 = vmatprep.subr.bf16.mxu0 %v2859_v23 }
 0x197   : > { %2593 = vmatmul.mubr.bf16.gmra.mrb[4].mxu0 %v2858_v22 }
 0x198   : > { %2609 = vmatpush3.bf16.msra.mxu0 %v2859_v23  ;;  %2596 = vmatprep.mubr.bf16.mxu0 %v2861_v25 }
 0x199   : > { %1233 = vmatmul.mubr.bf16.gmra.mrb[20].mxu1 %v2806_v40  ;;  %2610 = vmatprep.subr.bf16.mxu0 %v2860_v24 }
 0x19a   : > { %1240 = vmatprep.mubr.bf16.mxu1 %v2807_v41 }
 0x19c   : > { %2611 = vmatpush3.bf16.msra.mxu0 %v2860_v24 }
 0x19d   : > { %2612 = vmatprep.subr.bf16.mxu0 %v2863_v27 }
 0x19f   : > { %2597 = vmatmul.mubr.bf16.gmra.mrb[8].mxu0 %v2862_v26 }
 0x1a0   : > { %2613 = vmatpush3.bf16.msra.mxu0 %v2863_v27  ;;  %2600 = vmatprep.mubr.bf16.mxu0 %v2865_v29 }
 0x1a1   : > { %1241 = vmatmul.mubr.bf16.gmra.mrb[24].mxu1 %v2809_v42  ;;  %2614 = vmatprep.subr.bf16.mxu0 %v2864_v28 }
 0x1a2   : > { %1248 = vmatprep.mubr.bf16.mxu1 %v2810_v43 }
 0x1a4   : > { %2615 = vmatpush3.bf16.msra.mxu0 %v2864_v28 }
 0x1a5   : > { %2616 = vmatprep.subr.bf16.mxu0 %v2867_v31 }
 0x1a7   : > { %2601 = vmatmul.mubr.bf16.gmra.mrb[12].mxu0 %v2866_v30 }
 0x1a8   : > { %2617 = vmatpush3.bf16.msra.mxu0 %v2867_v31 }
 0x1a9   : > { %1249 = vmatmul.mubr.bf16.gmra.mrb[28].mxu1 %v2812_v44  ;;  %2618 = vmatprep.subr.bf16.mxu0 %v2868_v32 }
 0x1aa   : > { %1289 = vmatprep.mubr.bf16.mxu1 %v2815_v45 }
 0x1ac   : > { %2619 = vmatpush3.bf16.msra.mxu0 %v2868_v32 }
 0x1b1   : > { %1290 = vmatmul.mubr.bf16.vlgmr.msra.gmra.mrb[32].mxu1 %v2813_v46 }
 0x1b2   : > { %1297 = vmatprep.mubr.bf16.mxu1 %v2816_v47 }
 0x1b9   : > { %1298 = vmatmul.mubr.bf16.gmra.mrb[36].mxu1 %v2818_v48 }
 0x1ba   : > { %1305 = vmatprep.mubr.bf16.mxu1 %v2819_v49 }
 0x1c1   : > { %1306 = vmatmul.mubr.bf16.gmra.mrb[40].mxu1 %v2821_v50 }
 0x1c2   : > { %1313 = vmatprep.mubr.bf16.mxu1 %v2822_v51 }
 0x1c9   : > { %1314 = vmatmul.mubr.bf16.gmra.mrb[44].mxu1 %v2824_v53 }
 0x1ca   : > { %1321 = vmatprep.mubr.bf16.mxu1 %v2825_v54 }
 0x1d1   : > { %1322 = vmatmul.mubr.bf16.gmra.mrb[48].mxu1 %v2827_v57 }
 0x1d2   : > { %1329 = vmatprep.mubr.bf16.mxu1 %v2828_v58 }
 0x1d9   : > { %1330 = vmatmul.mubr.bf16.gmra.mrb[52].mxu1 %v2830_v63 }
 0x1da   : > { %1337 = vmatprep.mubr.bf16.mxu1 %v2831_v0 }
 0x1e1   : > { %1338 = vmatmul.mubr.bf16.gmra.mrb[56].mxu1 %v2833_v5 }
 0x1e2   : > { %1345 = vmatprep.mubr.bf16.mxu1 %v2834_v6 }
 0x1e9   : > { %1346 = vmatmul.mubr.bf16.gmra.mrb[60].mxu1 %v2836_v11 }
 0x244   : > { %v2380_v33 = vpop.f32.mrb[0].mxu1 }
 0x245   : > { %v2381_v34 = vpop.f32.mrb[1].mxu1 }
 0x246   : > { %v2382_v35 = vadd.f32 %v2381_v34, %v2380_v33  ;;  %v2383_v36 = vpop.f32.mrb[2].mxu1 }
 0x247   : > { %v2384_v37 = vpop.f32.mrb[3].mxu1 }
 0x248   : > { %v2385_v38 = vadd.f32 %v2384_v37, %v2383_v36 }
 0x24c   : > { %v2386_v39 = vpop.f32.mrb[4].mxu1 }
 0x24d   : > { %v2387_v40 = vpop.f32.mrb[5].mxu1 }
 0x24e   : > { %v2388_v41 = vadd.f32 %v2387_v40, %v2386_v39  ;;  %v2389_v42 = vpop.f32.mrb[6].mxu1 }
 0x24f   : > { %v2390_v43 = vpop.f32.mrb[7].mxu1 }
 0x250   : > { %v2391_v44 = vadd.f32 %v2390_v43, %v2389_v42 }
 0x254   : > { %v2392_v45 = vpop.f32.mrb[8].mxu1 }
 0x255   : > { %v2393_v46 = vpop.f32.mrb[9].mxu1 }
 0x256   : > { %v2394_v47 = vadd.f32 %v2393_v46, %v2392_v45  ;;  %v2395_v48 = vpop.f32.mrb[10].mxu1 }
 0x257   : > { %v2396_v49 = vpop.f32.mrb[11].mxu1 }
 0x258   : > { %v2397_v50 = vadd.f32 %v2396_v49, %v2395_v48 }
 0x25c   : > { %v2398_v51 = vpop.f32.mrb[12].mxu1 }
 0x25d   : > { %v2399_v52 = vpop.f32.mrb[13].mxu1 }
 0x25e   : > { %v3265_v53 = vadd.f32 %v2399_v52, %v2398_v51  ;;  %v2401_v54 = vpop.f32.mrb[14].mxu1 }
 0x25f   : > { %v2402_v55 = vpop.f32.mrb[15].mxu1 }
 0x260   : > { %v2403_v56 = vadd.f32 %v2402_v55, %v2401_v54 }
 0x264   : > { %v2404_v57 = vpop.f32.mrb[16].mxu1 }
 0x265   : > { %v2405_v58 = vpop.f32.mrb[17].mxu1 }
 0x266   : > { %v3267_v59 = vadd.f32 %v2405_v58, %v2404_v57  ;;  %v2407_v60 = vpop.f32.mrb[18].mxu1 }
 0x267   : > { %v2408_v61 = vpop.f32.mrb[19].mxu1 }
 0x268   : > { %v3269_v62 = vadd.f32 %v2408_v61, %v2407_v60 }
 0x26c   : > { %v2410_v63 = vpop.f32.mrb[20].mxu1 }
 0x26d   : > { %v2411_v0 = vpop.f32.mrb[21].mxu1 }
 0x26e   : > { %v3271_v1 = vadd.f32 %v2411_v0, %v2410_v63  ;;  %v2413_v2 = vpop.f32.mrb[22].mxu1 }
 0x26f   : > { %v2414_v3 = vpop.f32.mrb[23].mxu1 }
 0x270   : > { %v3273_v4 = vadd.f32 %v2414_v3, %v2413_v2 }
 0x274   : > { %v2416_v5 = vpop.f32.mrb[24].mxu1 }
 0x275   : > { %v2417_v6 = vpop.f32.mrb[25].mxu1 }
 0x276   : > { %v3275_v7 = vadd.f32 %v2417_v6, %v2416_v5  ;;  %v2419_v8 = vpop.f32.mrb[26].mxu1 }
 0x277   : > { %v2420_v9 = vpop.f32.mrb[27].mxu1 }
 0x278   : > { %v3277_v10 = vadd.f32 %v2420_v9, %v2419_v8 }
 0x27c   : > { %v2422_v11 = vpop.f32.mrb[28].mxu1 }
 0x27d   : > { %v2423_v12 = vpop.f32.mrb[29].mxu1 }
 0x27e   : > { %v3279_v13 = vadd.f32 %v2423_v12, %v2422_v11  ;;  %v2425_v14 = vpop.f32.mrb[30].mxu1 }
 0x27f   : > { %v2426_v15 = vpop.f32.mrb[31].mxu1 }
 0x280   : > { %v3281_v16 = vadd.f32 %v2426_v15, %v2425_v14 }
 0x284   : > { %v2444_v17 = vpop.f32.mrb[32].mxu1 }
 0x285   : > { %v2445_v18 = vpop.f32.mrb[33].mxu1 }
 0x286   : > { %v2446_v19 = vadd.f32 %v2445_v18, %v2444_v17  ;;  %v2447_v20 = vpop.f32.mrb[34].mxu1 }
 0x287   : > { %v2448_v21 = vpop.f32.mrb[35].mxu1 }
 0x288   : > { %v1292_v22 = vadd.f32 %v2446_v19, %v2382_v35  ;;  %v2449_v23 = vadd.f32 %v2448_v21, %v2447_v20 }
 0x28a   : > { %v1295_v24 = vadd.f32 %v2449_v23, %v2385_v38 }
 0x28c   : > { %v2450_v25 = vpop.f32.mrb[36].mxu1  ;;  %v1354_v26 = vpack.c.bf16 %v1295_v24, %v1292_v22 }
 0x28d   : > { %v2451_v27 = vpop.f32.mrb[37].mxu1 }
 0x28e   : > { %v2452_v28 = vadd.f32 %v2451_v27, %v2450_v25  ;;  %v2453_v29 = vpop.f32.mrb[38].mxu1  ;;  %2620 = vmatprep.mubr.bf16.mxu0 %v1354_v26 }
 0x28f   : > { %v2454_v30 = vpop.f32.mrb[39].mxu1 }
 0x290   : > { %v1300_v31 = vadd.f32 %v2452_v28, %v2388_v41  ;;  %v2455_v32 = vadd.f32 %v2454_v30, %v2453_v29  ;;  %v1932_v29 = vlaneseq  ;;  %v3296_v30 = vstv %s2967_s23 }
 0x292   : > { %v1303_v33 = vadd.f32 %v2455_v32, %v2391_v44 }
 0x294   : > { %v1355_v34 = vpack.c.bf16 %v1303_v33, %v1300_v31  ;;  %v2456_v36 = vpop.f32.mrb[40].mxu1 }
 0x295   : > { %v2457_v37 = vpop.f32.mrb[41].mxu1 }
 0x296   : > { %v2458_v39 = vadd.f32 %v2457_v37, %v2456_v36  ;;  %v2459_v40 = vpop.f32.mrb[42].mxu1  ;;  %2621 = vmatmul.mubr.bf16.vlgmr.msra.gmra.mrb[0].mxu0 %v1355_v34 }
 0x297   : > { %v2460_v42 = vpop.f32.mrb[43].mxu1 }
 0x298   : > { %v1308_v35 = vadd.f32 %v2458_v39, %v2394_v47  ;;  %v2461_v43 = vadd.f32 %v2460_v42, %v2459_v40 }
 0x29a   : > { %v1311_v38 = vadd.f32 %v2461_v43, %v2397_v50 }
 0x29c   : > { %v2462_v45 = vpop.f32.mrb[44].mxu1  ;;  %v1356_v46 = vpack.c.bf16 %v1311_v38, %v1308_v35 }
 0x29d   : > { %v2463_v48 = vpop.f32.mrb[45].mxu1 }
 0x29e   : > { %v2464_v49 = vadd.f32 %v2463_v48, %v2462_v45  ;;  %v2465_v51 = vpop.f32.mrb[46].mxu1  ;;  %2624 = vmatprep.mubr.bf16.mxu0 %v1356_v46 }
 0x29f   : > { %v2466_v52 = vpop.f32.mrb[47].mxu1 }
 0x2a0   : > { %v1316_v41 = vadd.f32 %v2464_v49, %v3265_v53  ;;  %v2467_v44 = vadd.f32 %v2466_v52, %v2465_v51 }
 0x2a2   : > { %v1319_v54 = vadd.f32 %v2467_v44, %v2403_v56 }
 0x2a4   : > { %v2468_v55 = vpop.f32.mrb[48].mxu1  ;;  %v1357_v57 = vpack.c.bf16 %v1319_v54, %v1316_v41 }
 0x2a5   : > { %v2469_v58 = vpop.f32.mrb[49].mxu1 }
 0x2a6   : > { %v2470_v60 = vadd.f32 %v2469_v58, %v2468_v55  ;;  %v2471_v61 = vpop.f32.mrb[50].mxu1  ;;  %2625 = vmatmul.mubr.bf16.gmra.mrb[4].mxu0 %v1357_v57 }
 0x2a7   : > { %v2472_v47 = vpop.f32.mrb[51].mxu1 }
 0x2a8   : > { %v1324_v50 = vadd.f32 %v2470_v60, %v3267_v59  ;;  %v2473_v63 = vadd.f32 %v2472_v47, %v2471_v61 }
 0x2aa   : > { %v1327_v0 = vadd.f32 %v2473_v63, %v3269_v62 }
 0x2ac   : > { %v2474_v2 = vpop.f32.mrb[52].mxu1  ;;  %v1358_v3 = vpack.c.bf16 %v1327_v0, %v1324_v50 }
 0x2ad   : > { %v2475_v5 = vpop.f32.mrb[53].mxu1 }
 0x2ae   : > { %v2476_v6 = vadd.f32 %v2475_v5, %v2474_v2  ;;  %v2477_v8 = vpop.f32.mrb[54].mxu1  ;;  %2628 = vmatprep.mubr.bf16.mxu0 %v1358_v3 }
 0x2af   : > { %v2478_v53 = vpop.f32.mrb[55].mxu1 }
 0x2b0   : > { %v1332_v56 = vadd.f32 %v2476_v6, %v3271_v1  ;;  %v2479_v9 = vadd.f32 %v2478_v53, %v2477_v8 }
 0x2b2   : > { %v1335_v11 = vadd.f32 %v2479_v9, %v3273_v4 }
 0x2b4   : > { %v2480_v12 = vpop.f32.mrb[56].mxu1  ;;  %v1359_v14 = vpack.c.bf16 %v1335_v11, %v1332_v56 }
 0x2b5   : > { %v2481_v15 = vpop.f32.mrb[57].mxu1 }
 0x2b6   : > { %v2482_v17 = vadd.f32 %v2481_v15, %v2480_v12  ;;  %v2483_v59 = vpop.f32.mrb[58].mxu1  ;;  %2629 = vmatmul.mubr.bf16.gmra.mrb[8].mxu0 %v1359_v14 }
 0x2b7   : > { %v2484_v18 = vpop.f32.mrb[59].mxu1 }
 0x2b8   : > { %v1340_v62 = vadd.f32 %v2482_v17, %v3275_v7  ;;  %v2485_v19 = vadd.f32 %v2484_v18, %v2483_v59  ;;  %v3292_v7 = vshrl.u32 %v1932_v29, 7 }
 0x2ba   : > { %v1343_v20 = vadd.f32 %v2485_v19, %v3277_v10  ;;  %v1935_v10 = vadd.s32 16, %v3292_v7  ;;  %v1936_v31 = vadd.s32 24, %v3292_v7  ;;  %v1934_v32 = vadd.s32 8, %v3292_v7 }
 0x2bb   : > { %v1939_v52 = vadd.s32 48, %v3292_v7  ;;  %v1937_v41 = vadd.s32 32, %v3292_v7  ;;  %v1940_v44 = vadd.s32 56, %v3292_v7  ;;  %v1938_v54 = vadd.s32 40, %v3292_v7 }
 0x2bc   : > { %v2486_v21 = vpop.f32.mrb[60].mxu1  ;;  %v1360_v22 = vpack.c.bf16 %v1343_v20, %v1340_v62  ;;  %v1952_v33 = vadd.s32 %v3296_v30, %v1935_v10  ;;  %v1953_v34 = vadd.s32 %v3296_v30, %v1936_v31  ;;  %v1951_v36 = vadd.s32 %v3296_v30, %v1934_v32 }
 0x2bd   : > { %v2487_v23 = vpop.f32.mrb[61].mxu1  ;;  %v1956_v55 = vadd.s32 %v3296_v30, %v1939_v52  ;;  %v1954_v57 = vadd.s32 %v3296_v30, %v1937_v41  ;;  %v1957_v58 = vadd.s32 %v3296_v30, %v1940_v44  ;;  %v1955_v60 = vadd.s32 %v3296_v30, %v1938_v54 }
 0x2be   : > { %v2488_v1 = vadd.f32 %v2487_v23, %v2486_v21  ;;  %v2489_v24 = vpop.f32.mrb[62].mxu1  ;;  %2632 = vmatprep.mubr.bf16.mxu0 %v1360_v22  ;;  %vm1968_vm0 = vcmp.lt.s32.totalorder %v1952_v33, 512  ;;  %vm1969_vm2 = vcmp.lt.s32.totalorder %v1953_v34, 512  ;;  %vm1967_vm3 = vcmp.lt.s32.totalorder %v1951_v36, 512 }
 0x2bf   : > { %v2490_v4 = vpop.f32.mrb[63].mxu1  ;;  %vm1972_vm4 = vcmp.lt.s32.totalorder %v1956_v55, 512  ;;  %vm1970_vm5 = vcmp.lt.s32.totalorder %v1954_v57, 512  ;;  %vm1973_vm6 = vcmp.lt.s32.totalorder %v1957_v58, 512  ;;  %vm1971_vm7 = vcmp.lt.s32.totalorder %v1955_v60, 512 }
 0x2c0   : > { %v1348_v25 = vadd.f32 %v2488_v1, %v3279_v13  ;;  %v2491_v26 = vadd.f32 %v2490_v4, %v2489_v24  ;;  %v1950_v13 = vadd.s32 %v3296_v30, %v3292_v7  ;;  %v1943_v9 = vadd.s32 80, %v3292_v7 }
 0x2c1   : > { %v1941_v11 = vadd.s32 64, %v3292_v7  ;;  %v1944_v12 = vadd.s32 88, %v3292_v7  ;;  %v1942_v14 = vadd.s32 72, %v3292_v7  ;;  %v1945_v29 = vadd.s32 96, %v3292_v7 }
 0x2c2   : > { %v1351_v27 = vadd.f32 %v2491_v26, %v3281_v16  ;;  %v3306_v16 = vld [vmem:[%s3384_s3] ss:$0 sm:$0xff]  ;;  %vm1966_vm1 = vcmp.lt.s32.totalorder %v1950_v13, 512  ;;  %v1960_v15 = vadd.s32 %v3296_v30, %v1943_v9  ;;  %v1948_v10 = vadd.s32 120, %v3292_v7 }
 0x2c3   : > { %v1958_v17 = vadd.s32 %v3296_v30, %v1941_v11  ;;  %v1961_v59 = vadd.s32 %v3296_v30, %v1944_v12  ;;  %v1959_v18 = vadd.s32 %v3296_v30, %v1942_v14  ;;  %v1946_v31 = vadd.s32 104, %v3292_v7 }
 0x2c4   : > { %v1361_v28 = vpack.c.bf16 %v1351_v27, %v1348_v25  ;;  %vm1976_vm8 = vcmp.lt.s32.totalorder %v1960_v15, 512  ;;  %v1962_v33 = vadd.s32 %v3296_v30, %v1945_v29  ;;  %v1965_v13 = vadd.s32 %v3296_v30, %v1948_v10 }
 0x2c5   : > { %vm1974_vm9 = vcmp.lt.s32.totalorder %v1958_v17, 512  ;;  %vm1977_vm10 = vcmp.lt.s32.totalorder %v1961_v59, 512  ;;  %vm1975_vm11 = vcmp.lt.s32.totalorder %v1959_v18, 512  ;;  %v1963_v34 = vadd.s32 %v3296_v30, %v1946_v31 }
 0x2c6   : > { %2633 = vmatmul.mubr.bf16.gmra.mrb[12].mxu0 %v1361_v28  ;;  %v1947_v28 = vadd.s32 112, %v3292_v7  ;;  %vm1978_vm13 = vcmp.lt.s32.totalorder %v1962_v33, 512  ;;  %vm1981_vm14 = vcmp.lt.s32.totalorder %v1965_v13, 512 }
 0x2c7   : > { %vm1979_vm15 = vcmp.lt.s32.totalorder %v1963_v34, 512 }
 0x2c8   : > { %v1964_v32 = vadd.s32 %v3296_v30, %v1947_v28 }
 0x2ca   : > { %vm1980_vm12 = vcmp.lt.s32.totalorder %v1964_v32, 512 }
 0x369   : > { %v2622_v37 = vpop.f32.mrb[0].mxu0 }
 0x36a   : > { %v1918_v39 = vadd.f32 %v2622_v37, %v3306_v16  ;;  %v1830_v40 = vpop.f32.mrb[1].mxu0 }
 0x36b   : > { %v1916_v42 = vadd.f32 %v3306_v16, %v1830_v40  ;;  %v2623_v35 = vpop.f32.mrb[2].mxu0 }
 0x36c   : > { %v1984_v43 = vsel %vm1968_vm0, %v1918_v39, 0.0  ;;  %v1919_v38 = vadd.f32 %v2623_v35, %v3306_v16  ;;  %v1833_v45 = vpop.f32.mrb[3].mxu0 }
 0x36d   : > { %2000 = vst [vmem:[%s2977_s5 + $0x10] sm:$0xff] %v1984_v43  ;;  %v1982_v46 = vsel %vm1966_vm1, %v1916_v42, 0.0  ;;  %v1917_v48 = vadd.f32 %v3306_v16, %v1833_v45 }
 0x36e   : > { %1998 = vst [vmem:[%s2977_s5] sm:$0xff] %v1982_v46  ;;  %v1985_v49 = vsel %vm1969_vm2, %v1919_v38, 0.0 }
 0x36f   : > { %2001 = vst [vmem:[%s2977_s5 + $0x18] sm:$0xff] %v1985_v49  ;;  %v1983_v51 = vsel %vm1967_vm3, %v1917_v48, 0.0 }
 0x370   : > { %1999 = vst [vmem:[%s2977_s5 + $0x8] sm:$0xff] %v1983_v51 }
 0x379   : > { %v2626_v61 = vpop.f32.mrb[4].mxu0 }
 0x37a   : > { %v1922_v47 = vadd.f32 %v2626_v61, %v3306_v16  ;;  %v1846_v50 = vpop.f32.mrb[5].mxu0 }
 0x37b   : > { %v1920_v63 = vadd.f32 %v3306_v16, %v1846_v50  ;;  %v2627_v0 = vpop.f32.mrb[6].mxu0 }
 0x37c   : > { %v1988_v2 = vsel %vm1972_vm4, %v1922_v47, 0.0  ;;  %v1923_v3 = vadd.f32 %v2627_v0, %v3306_v16  ;;  %v1849_v5 = vpop.f32.mrb[7].mxu0 }
 0x37d   : > { %2004 = vst [vmem:[%s2977_s5 + $0x30] sm:$0xff] %v1988_v2  ;;  %v1986_v6 = vsel %vm1970_vm5, %v1920_v63, 0.0  ;;  %v1921_v8 = vadd.f32 %v3306_v16, %v1849_v5 }
 0x37e   : > { %2002 = vst [vmem:[%s2977_s5 + $0x20] sm:$0xff] %v1986_v6  ;;  %v1989_v53 = vsel %vm1973_vm6, %v1923_v3, 0.0 }
 0x37f   : > { %2005 = vst [vmem:[%s2977_s5 + $0x38] sm:$0xff] %v1989_v53  ;;  %v1987_v56 = vsel %vm1971_vm7, %v1921_v8, 0.0 }
 0x380   : > { %2003 = vst [vmem:[%s2977_s5 + $0x28] sm:$0xff] %v1987_v56 }
 0x389   : > { %v2630_v62 = vpop.f32.mrb[8].mxu0 }
 0x38a   : > { %v1926_v19 = vadd.f32 %v2630_v62, %v3306_v16  ;;  %v1862_v20 = vpop.f32.mrb[9].mxu0 }
 0x38b   : > { %v1924_v21 = vadd.f32 %v3306_v16, %v1862_v20  ;;  %v2631_v22 = vpop.f32.mrb[10].mxu0 }
 0x38c   : > { %v1992_v23 = vsel %vm1976_vm8, %v1926_v19, 0.0  ;;  %v1927_v1 = vadd.f32 %v2631_v22, %v3306_v16  ;;  %v1865_v24 = vpop.f32.mrb[11].mxu0 }
 0x38d   : > { %2008 = vst [vmem:[%s2977_s5 + $0x50] sm:$0xff] %v1992_v23  ;;  %v1990_v4 = vsel %vm1974_vm9, %v1924_v21, 0.0  ;;  %v1925_v25 = vadd.f32 %v3306_v16, %v1865_v24 }
 0x38e   : > { %2006 = vst [vmem:[%s2977_s5 + $0x40] sm:$0xff] %v1990_v4  ;;  %v1993_v26 = vsel %vm1977_vm10, %v1927_v1, 0.0 }
 0x38f   : > { %2009 = vst [vmem:[%s2977_s5 + $0x58] sm:$0xff] %v1993_v26  ;;  %v1991_v27 = vsel %vm1975_vm11, %v1925_v25, 0.0 }
 0x390   : > { %2007 = vst [vmem:[%s2977_s5 + $0x48] sm:$0xff] %v1991_v27 }
 0x399   : > { %v2634_v36 = vpop.f32.mrb[12].mxu0 }
 0x39a   : > { %v1930_v37 = vadd.f32 %v2634_v36, %v3306_v16  ;;  %v1878_v39 = vpop.f32.mrb[13].mxu0 }
 0x39b   : > { %v1928_v7 = vadd.f32 %v3306_v16, %v1878_v39  ;;  %v2635_v40 = vpop.f32.mrb[14].mxu0 }
 0x39c   : > { %v1996_v42 = vsel %vm1980_vm12, %v1930_v37, 0.0  ;;  %v1931_v35 = vadd.f32 %v2635_v40, %v3306_v16  ;;  %v1881_v43 = vpop.f32.mrb[15].mxu0 }
 0x39d   : > { %2012 = vst [vmem:[%s2977_s5 + $0x70] sm:$0xff] %v1996_v42  ;;  %v1994_v30 = vsel %vm1978_vm13, %v1928_v7, 0.0  ;;  %v1929_v38 = vadd.f32 %v3306_v16, %v1881_v43 }
 0x39e   : > { %2010 = vst [vmem:[%s2977_s5 + $0x60] sm:$0xff] %v1994_v30  ;;  %v1997_v45 = vsel %vm1981_vm14, %v1931_v35, 0.0 }
 0x39f   : > { %2013 = vst [vmem:[%s2977_s5 + $0x78] sm:$0xff] %v1997_v45  ;;  %v1995_v46 = vsel %vm1979_vm15, %v1929_v38, 0.0 }
 0x3a0   : > { %2011 = vst [vmem:[%s2977_s5 + $0x68] sm:$0xff] %v1995_v46 }
 0x3a1 PF: > { %s14_s19 = sadd.s32 1, %s2907_s19   ;;  %s3386_s15 = smov %s2899_s17 }
 0x3a2   : > { %p11_p8 = scmp.ge.s32.totalorder %s14_s19, 10   ;;  %s3387_s16 = smov %s2903_s18 }
 0x3a3   : > { %s3388_s17 = smov %s3391_s20  ;;  %s3389_s18 = smov %s3395_s21 }
 0x3a4   :  { %13 = sbr.rel (!%p11_p8) target bundleno = 3 (0x3), region = 77 }

</bundles_post_ra>
